<compile_context>
chip_gen: v7x
topology: tpu7x:2x2x1
jax: 0.10.0
libtpu: 0.0.40
codegen_flags: <defaults>
</compile_context>

<pallas_src>
import numpy as np
import jax
import jax.numpy as jnp
from jax.experimental import pallas as pl
from jax.experimental.pallas import tpu as pltpu

# ---------------- synthetic SMPL-X sizes ----------------
NUM_BETAS = 11
NUM_JOINTS = 55                       # global + 21 body + jaw + 2 eyes + 2*15 hands
NUM_VERTS = 512                       # synthetic (real SMPL-X: 10475)
POSE_FEAT = (NUM_JOINTS - 1) * 9      # 486
FOCAL_LENGTH = 5000.0
IMG_RES = 224

V3 = 3 * NUM_VERTS                    # vertex lanes (coordinate-major: c*V + v)
J3 = 3 * NUM_JOINTS                   # joint lanes ((j, c) row-major)
LANE_TILE = 512                       # lane tile for the fused blendshape axis
N_LANE_TILES = -(-(V3 + J3) // LANE_TILE)
LANE_TOTAL = N_LANE_TILES * LANE_TILE
N_POSE_TILES = -(-V3 // LANE_TILE)    # tiles that touch vertex lanes (need posedirs)
POSE_LANE_TOTAL = N_POSE_TILES * LANE_TILE
V_TILE = 256                          # vertex tile for skinning
NJ_PAD = 128                          # lane-dense pad of joint axis for projection
VMEM_LIMIT = 32 * 1024 * 1024


# ============================================================
# Pallas kernels
# ============================================================

def _blendshape_kernel(betas_ref, pose_feat_ref, template_ref, shapedirs_ref,
                       posedirs_ref, out_ref):
    # betas (B,11) f32, pose_feat (B,486) f32; weights bf16 tiles (.., LANE_TILE).
    # Output tile = template + betas@shapedirs [+ pose_feat@posedirs for tiles
    # containing vertex lanes; joint/pad lanes have zero pose correctives].
    t = pl.program_id(0)
    betas = betas_ref[...].astype(jnp.bfloat16)
    base = template_ref[...] + jnp.dot(
        betas, shapedirs_ref[...], preferred_element_type=jnp.float32)

    @pl.when(t < N_POSE_TILES)
    def _():
        pf = pose_feat_ref[...].astype(jnp.bfloat16)
        out_ref[...] = base + jnp.dot(
            pf, posedirs_ref[...], preferred_element_type=jnp.float32)

    @pl.when(t >= N_POSE_TILES)
    def _():
        out_ref[...] = base


def _skinning_kernel(a2d_ref, vp_ref, w_ref, out_ref):
    # a2d (16B, NJ): rows k*B+b hold component k of batch b's relative 4x4.
    # w   (NJ, V_tile) bf16 lbs weights (transposed).
    # vp  (3B, V_tile): rows c*B+b hold coordinate c of batch b's v_posed.
    T = jnp.dot(a2d_ref[...].astype(jnp.bfloat16), w_ref[...],
                preferred_element_type=jnp.float32)          # (16B, V_tile)
    b = vp_ref.shape[0] // 3
    vp = vp_ref[...]
    vx, vy, vz = vp[0:b, :], vp[b:2 * b, :], vp[2 * b:3 * b, :]

    def t(k):
        return T[k * b:(k + 1) * b, :]

    ox = t(0) * vx + t(1) * vy + t(2) * vz + t(3)
    oy = t(4) * vx + t(5) * vy + t(6) * vz + t(7)
    oz = t(8) * vx + t(9) * vy + t(10) * vz + t(11)
    out_ref[...] = jnp.concatenate([ox, oy, oz], axis=0)      # single dense store


def _cam_proj_kernel(camp_ref, kflat_ref, j3_ref, cam_t_ref, j2d_ref):
    # Fused convert_pare_to_full_img_cam + perspective_projection (rotation=I),
    # whole batch in one grid point.
    # camp (B,8): [s, tx, ty, bbox_scale, center_x, center_y, img_w, img_h]
    # kflat (B,9): cam_intrinsics row-major.  j3 (3, B, NJ_PAD), pad z = 1.
    camp = camp_ref[...]
    k = kflat_ref[...]
    s = camp[:, 0:1]
    tx = camp[:, 1:2]
    ty = camp[:, 2:3]
    bbox_h = camp[:, 3:4] * 200.0
    ctr_x = camp[:, 4:5]
    ctr_y = camp[:, 5:6]
    imw = camp[:, 6:7]
    imh = camp[:, 7:8]
    focal = k[:, 0:1]

    res = 224.0
    r = bbox_h / res
    tz = 2.0 * focal / (r * res * s)
    inv_sb = 1.0 / (s * bbox_h)
    cam_tx = tx + 2.0 * (ctr_x - imw / 2.0) * inv_sb
    cam_ty = ty + 2.0 * (ctr_y - imh / 2.0) * inv_sb
    cam_t_ref[...] = jnp.concatenate([cam_tx, cam_ty, tz], axis=1)   # (B, 3)

    j3 = j3_ref[...]                                                 # (3, B, NJP)
    px = j3[0] + cam_tx
    py = j3[1] + cam_ty
    pz = j3[2] + tz
    inv_z = 1.0 / pz
    xh = px * inv_z
    yh = py * inv_z
    u = k[:, 0:1] * xh + k[:, 1:2] * yh + k[:, 2:3]
    v = k[:, 3:4] * xh + k[:, 4:5] * yh + k[:, 5:6]
    j2d_ref[...] = jnp.stack([u, v], axis=0)                         # (2, B, NJP)


# ============================================================
# pallas_call wrappers
# ============================================================

def _blendshapes_call(betas, pose_feat, params):
    B = betas.shape[0]
    return pl.pallas_call(
        _blendshape_kernel,
        out_shape=jax.ShapeDtypeStruct((B, LANE_TOTAL), jnp.float32),
        grid=(N_LANE_TILES,),
        in_specs=[
            pl.BlockSpec((B, NUM_BETAS), lambda t: (0, 0)),
            pl.BlockSpec((B, POSE_FEAT), lambda t: (0, 0)),
            pl.BlockSpec((1, LANE_TILE), lambda t: (0, t)),
            pl.BlockSpec((NUM_BETAS, LANE_TILE), lambda t: (0, t)),
            # Clamp so the joint-only tile reuses the previous posedirs block
            # (DMA skipped); the matmul itself is skipped with pl.when.
            pl.BlockSpec((POSE_FEAT, LANE_TILE),
                         lambda t: (0, jnp.minimum(t, N_POSE_TILES - 1))),
        ],
        out_specs=pl.BlockSpec((B, LANE_TILE), lambda t: (0, t)),
        compiler_params=pltpu.CompilerParams(
            dimension_semantics=("parallel",),
            vmem_limit_bytes=VMEM_LIMIT),
    )(betas, pose_feat, params['template_ext'], params['shapedirs_ext'],
      params['posedirs_ext'])


def _skinning_call(a2d, vp3, params):
    rows_a = a2d.shape[0]     # 16*B
    rows_v = vp3.shape[0]     # 3*B
    V = vp3.shape[1]
    n_tiles = V // V_TILE
    return pl.pallas_call(
        _skinning_kernel,
        out_shape=jax.ShapeDtypeStruct((rows_v, V), jnp.float32),
        grid=(n_tiles,),
        in_specs=[
            pl.BlockSpec((rows_a, NUM_JOINTS), lambda t: (0, 0)),
            pl.BlockSpec((rows_v, V_TILE), lambda t: (0, t)),
            pl.BlockSpec((NUM_JOINTS, V_TILE), lambda t: (0, t)),
        ],
        out_specs=pl.BlockSpec((rows_v, V_TILE), lambda t: (0, t)),
        compiler_params=pltpu.CompilerParams(
            dimension_semantics=("parallel",),
            vmem_limit_bytes=VMEM_LIMIT),
    )(a2d, vp3, params['lbs_weights_t'])


def _cam_proj_call(camp, kflat, j3p):
    B = camp.shape[0]
    return pl.pallas_call(
        _cam_proj_kernel,
        out_shape=(jax.ShapeDtypeStruct((B, 3), jnp.float32),
                   jax.ShapeDtypeStruct((2, B, NJ_PAD), jnp.float32)),
    )(camp, kflat, j3p)


# ============================================================
# Glue (parameter setup, kinematic chain, reshapes)
# ============================================================

def aa_to_rotmat(aa):
    """Axis-angle -> rotation matrix (Rodrigues), aa: [..., 3]."""
    angle = jnp.linalg.norm(aa, axis=-1, keepdims=True) + 1e-8
    axis = aa / angle
    x, y, z = axis[..., 0], axis[..., 1], axis[..., 2]
    c = jnp.cos(angle[..., 0])
    s = jnp.sin(angle[..., 0])
    C = 1.0 - c
    row0 = jnp.stack([c + x * x * C, x * y * C - z * s, x * z * C + y * s], -1)
    row1 = jnp.stack([y * x * C + z * s, c + y * y * C, y * z * C - x * s], -1)
    row2 = jnp.stack([z * x * C - y * s, z * y * C + x * s, c + z * z * C], -1)
    return jnp.stack([row0, row1, row2], axis=-2)


def batch_rigid_transform(rot_mats, joints, parents):
    """SMPL-X rigid kinematic chain, depth-grouped batched 4x4 matmuls."""
    B, J = joints.shape[:2]
    dtype = joints.dtype
    parents_np = np.asarray(parents)

    rel_joints = joints - jnp.concatenate(
        [jnp.zeros((B, 1, 3), dtype), joints[:, parents_np[1:]]], axis=1)
    bottom = jnp.broadcast_to(jnp.array([0.0, 0.0, 0.0, 1.0], dtype), (B, J, 1, 4))
    tm = jnp.concatenate(
        [jnp.concatenate([rot_mats, rel_joints[..., None]], axis=-1), bottom],
        axis=-2)                                                  # (B, J, 4, 4)

    # depth grouping: joints at the same tree depth are composed in one batch.
    depth = np.zeros(J, np.int32)
    for i in range(1, J):
        depth[i] = depth[parents_np[i]] + 1
    transforms = tm                                               # depth-0 correct
    for d in range(1, int(depth.max()) + 1):
        idx = np.where(depth == d)[0]
        par = parents_np[idx]
        new_tf = jnp.matmul(transforms[:, par], tm[:, idx])
        transforms = transforms.at[:, idx].set(new_tf)

    posed_joints = transforms[:, :, :3, 3]
    joints_h = jnp.concatenate([joints, jnp.zeros((B, J, 1), dtype)], axis=-1)
    tj = jnp.einsum('bjik,bjk->bji', transforms, joints_h)        # (B, J, 4)
    rel = transforms - jnp.concatenate(
        [jnp.zeros((B, J, 4, 3), dtype), tj[..., None]], axis=-1)
    return posed_joints, rel


def init_smplx_params(key):
    """Deterministic synthetic stand-in for the SMPL-X model file."""
    ks = jax.random.split(key, 5)
    v_template = 0.3 * jax.random.normal(ks[0], (NUM_VERTS, 3), jnp.float32)
    shapedirs = 0.01 * jax.random.normal(ks[1], (NUM_VERTS, 3, NUM_BETAS), jnp.float32)
    posedirs = 0.001 * jax.random.normal(ks[2], (POSE_FEAT, V3), jnp.float32)
    j_regressor = jax.nn.softmax(
        jax.random.normal(ks[3], (NUM_JOINTS, NUM_VERTS), jnp.float32), axis=-1)
    lbs_weights = jax.nn.softmax(
        4.0 * jax.random.normal(ks[4], (NUM_VERTS, NUM_JOINTS), jnp.float32), axis=-1)
    parents = np.concatenate([[-1], np.arange(NUM_JOINTS - 1) // 2]).astype(np.int32)

    # Fused lane axis: [vertex region (coord-major c*V+v) | joint region (j,c) | pad].
    # TODO(synk): real SMPL-X assets store posedirs/shapedirs flattened (v, c)
    # interleaved; they must be reordered into this coordinate-major layout on load.
    shapedirs_cm = shapedirs.transpose(1, 0, 2).reshape(V3, NUM_BETAS)        # (3V, 11)
    j_shapedirs = jnp.einsum('jv,vck->jck', j_regressor, shapedirs).reshape(J3, NUM_BETAS)
    shapedirs_ext = jnp.zeros((LANE_TOTAL, NUM_BETAS), jnp.float32)
    shapedirs_ext = shapedirs_ext.at[:V3].set(shapedirs_cm)
    shapedirs_ext = shapedirs_ext.at[V3:V3 + J3].set(j_shapedirs)
    shapedirs_ext = shapedirs_ext.T.astype(jnp.bfloat16)                      # (11, L)

    # posedirs only needs to cover the vertex-lane tiles (joint correctives are 0).
    posedirs_ext = jnp.zeros((POSE_FEAT, POSE_LANE_TOTAL), jnp.float32)
    posedirs_ext = posedirs_ext.at[:, :V3].set(posedirs)
    posedirs_ext = posedirs_ext.astype(jnp.bfloat16)

    j_template = j_regressor @ v_template                                     # (J, 3)
    template_ext = jnp.zeros((1, LANE_TOTAL), jnp.float32)
    template_ext = template_ext.at[0, :V3].set(v_template.T.reshape(-1))
    template_ext = template_ext.at[0, V3:V3 + J3].set(j_template.reshape(-1))

    return {
        'template_ext': template_ext,
        'shapedirs_ext': shapedirs_ext,
        'posedirs_ext': posedirs_ext,
        'lbs_weights_t': lbs_weights.T.astype(jnp.bfloat16),                  # (NJ, V)
        'parents': parents,
    }


def smplx_head_cam_full_forward(params, body_pose, lhand_pose, rhand_pose, shape,
                                cam, cam_intrinsics, bbox_scale, bbox_center,
                                img_w, img_h):
    """Mirrors SMPLXHeadCamFull.forward (pose2rot=False, flat_hand_mean=True)."""
    B = shape.shape[0]
    dtype = jnp.float32
    eye1 = jnp.broadcast_to(jnp.eye(3, dtype=dtype), (B, 1, 3, 3))

    global_orient = body_pose[:, 0:1]
    body21 = body_pose[:, 1:]
    # jaw / leye / reye default to zero pose -> identity rotations
    rot_mats = jnp.concatenate(
        [global_orient, body21, eye1, eye1, eye1, lhand_pose, rhand_pose], axis=1)

    pose_feat = (rot_mats[:, 1:] - jnp.eye(3, dtype=dtype)).reshape(B, POSE_FEAT)
    betas = shape.reshape(B, NUM_BETAS).astype(dtype)

    # --- LBS hot path: blend shapes + pose correctives + joint regression ---
    blend = _blendshapes_call(betas, pose_feat, params)          # (B, LANE_TOTAL)
    v_posed_cm = blend[:, :V3].reshape(B, 3, NUM_VERTS)          # coord-major
    j_rest = blend[:, V3:V3 + J3].reshape(B, NUM_JOINTS, 3)

    # --- kinematic chain (tiny, depth-grouped, plain JAX glue) ---
    joints3d, rel_transforms = batch_rigid_transform(rot_mats, j_rest,
                                                     params['parents'])

    # --- LBS hot path: skinning, batch packed into MXU rows / sublanes ---
    a2d = rel_transforms.reshape(B, NUM_JOINTS, 16).transpose(2, 0, 1).reshape(
        16 * B, NUM_JOINTS)                                      # row = k*B + b
    vp3 = v_posed_cm.transpose(1, 0, 2).reshape(3 * B, NUM_VERTS)  # row = c*B + b
    verts3 = _skinning_call(a2d, vp3, params)                    # (3B, V)
    vertices = verts3.reshape(3, B, NUM_VERTS).transpose(1, 2, 0)  # (B, V, 3)

    # TODO(synk): smplx's extra vertex-selected landmark joints (vertex_joint_selector,
    # face/hand tip keypoints) are file-data dependent and omitted; joints3d are the
    # 55 posed kinematic-tree joints.

    # --- fused camera conversion + perspective projection (one pallas_call) ---
    camp = jnp.concatenate(
        [cam.astype(dtype),
         bbox_scale.astype(dtype).reshape(B, 1),
         bbox_center.astype(dtype),
         img_w.astype(dtype).reshape(B, 1),
         img_h.astype(dtype).reshape(B, 1)], axis=1)             # (B, 8)
    kflat = cam_intrinsics.astype(dtype).reshape(B, 9)
    jt = joints3d.transpose(2, 0, 1)                             # (3, B, NJ)
    pad_n = NJ_PAD - NUM_JOINTS
    pad = jnp.concatenate(
        [jnp.zeros((2, B, pad_n), dtype), jnp.ones((1, B, pad_n), dtype)], axis=0)
    j3p = jnp.concatenate([jt, pad], axis=2)                     # (3, B, NJ_PAD)

    cam_t, j2d_pad = _cam_proj_call(camp, kflat, j3p)
    joints2d = j2d_pad[:, :, :NUM_JOINTS].transpose(1, 2, 0)     # (B, NJ, 2)

    return {'vertices': vertices, 'joints3d': joints3d,
            'joints2d': joints2d, 'pred_cam_t': cam_t}


# ============================================================
# main
# ============================================================

if __name__ == "__main__":
    key = jax.random.PRNGKey(0)
    kp, kin = jax.random.split(key)
    params = init_smplx_params(kp)

    B = 2
    keys = jax.random.split(kin, 9)
    body_pose = aa_to_rotmat(0.2 * jax.random.normal(keys[0], (B, 22, 3)))
    lhand_pose = aa_to_rotmat(0.2 * jax.random.normal(keys[1], (B, 15, 3)))
    rhand_pose = aa_to_rotmat(0.2 * jax.random.normal(keys[2], (B, 15, 3)))
    shape = jax.random.normal(keys[3], (B, NUM_BETAS))

    s = 0.8 + 0.4 * jax.random.uniform(keys[4], (B, 1))
    txy = 0.1 * jax.random.normal(keys[5], (B, 2))
    cam = jnp.concatenate([s, txy], axis=1)                              # (B,3)

    img_w = jnp.array([1920.0, 1280.0])
    img_h = jnp.array([1080.0, 720.0])
    focal = jnp.full((B,), FOCAL_LENGTH)
    cam_intrinsics = (jnp.zeros((B, 3, 3))
                      .at[:, 0, 0].set(focal).at[:, 1, 1].set(focal)
                      .at[:, 0, 2].set(img_w / 2.0).at[:, 1, 2].set(img_h / 2.0)
                      .at[:, 2, 2].set(1.0))
    bbox_scale = 1.0 + 0.5 * jax.random.uniform(keys[6], (B,))
    bbox_center = jnp.stack(
        [img_w * (0.4 + 0.2 * jax.random.uniform(keys[7], (B,))),
         img_h * (0.4 + 0.2 * jax.random.uniform(keys[8], (B,)))], axis=1)

    fwd = jax.jit(lambda *a: smplx_head_cam_full_forward(params, *a))
    out = fwd(body_pose, lhand_pose, rhand_pose, shape, cam, cam_intrinsics,
              bbox_scale, bbox_center, img_w, img_h)
    out = jax.block_until_ready(out)

    assert out['vertices'].shape == (B, NUM_VERTS, 3)
    assert out['joints3d'].shape == (B, NUM_JOINTS, 3)
    assert out['joints2d'].shape == (B, NUM_JOINTS, 2)
    assert out['pred_cam_t'].shape == (B, 3)
    assert all(bool(jnp.isfinite(v).all()) for v in out.values())
    print("KERNEL_OK")
</pallas_src>

<mosaic_0001>
module attributes {stable_mosaic.version = 11 : i64} {
  func.func @_blendshape_kernel(%arg0: i32, %arg1: memref<2x11xf32, #tpu.memory_space<vmem>>, %arg2: memref<2x486xf32, #tpu.memory_space<vmem>>, %arg3: memref<1x512xf32, #tpu.memory_space<vmem>>, %arg4: memref<11x512xbf16, #tpu.memory_space<vmem>>, %arg5: memref<486x512xbf16, #tpu.memory_space<vmem>>, %arg6: memref<2x512xf32, #tpu.memory_space<vmem>>) attributes {dimension_semantics = [#tpu.dimension_semantics<parallel>], iteration_bounds = array<i64: 4>, scalar_prefetch = 0 : i64, scratch_operands = 0 : i64, tpu.core_type = #tpu.core_type<tc>, window_params = [{pipeline_mode = #tpu.pipeline_mode<synchronous>, transform_indices = @transform_0, window_bounds = array<i64: 2, 11>}, {pipeline_mode = #tpu.pipeline_mode<synchronous>, transform_indices = @transform_1, window_bounds = array<i64: 2, 486>}, {transform_indices = @transform_2, window_bounds = array<i64: 1, 512>}, {transform_indices = @transform_3, window_bounds = array<i64: 11, 512>}, {transform_indices = @transform_4, window_bounds = array<i64: 486, 512>}, {transform_indices = @transform_5, window_bounds = array<i64: 2, 512>}]} {
    %c0 = arith.constant 0 : index
    %c0_0 = arith.constant 0 : index
    %0 = vector.load %arg1[%c0, %c0_0] : memref<2x11xf32, #tpu.memory_space<vmem>>, vector<2x11xf32>
    %1 = arith.truncf %0 : vector<2x11xf32> to vector<2x11xbf16>
    %c0_1 = arith.constant 0 : index
    %c0_2 = arith.constant 0 : index
    %2 = vector.load %arg3[%c0_1, %c0_2] : memref<1x512xf32, #tpu.memory_space<vmem>>, vector<1x512xf32>
    %c0_3 = arith.constant 0 : index
    %c0_4 = arith.constant 0 : index
    %3 = vector.load %arg4[%c0_3, %c0_4] : memref<11x512xbf16, #tpu.memory_space<vmem>>, vector<11x512xbf16>
    %cst = arith.constant dense<0.000000e+00> : vector<2x512xf32>
    %4 = tpu.matmul %1, %3, %cst {dimension_numbers = #tpu.dot_dimension_numbers<[1], [0], [0], [1], [0, 0, 1, 1], [], []>} : vector<2x11xbf16>, vector<11x512xbf16>, vector<2x512xf32> -> vector<2x512xf32>
    %5 = vector.broadcast %2 : vector<1x512xf32> to vector<2x512xf32>
    %6 = arith.addf %5, %4 : vector<2x512xf32>
    %c3_i32 = arith.constant 3 : i32
    %7 = arith.cmpi slt, %arg0, %c3_i32 : i32
    %8 = arith.extui %7 : i1 to i32
    %c0_i32 = arith.constant 0 : i32
    %9 = arith.cmpi ne, %8, %c0_i32 : i32
    scf.if %9 {
      %c0_7 = arith.constant 0 : index
      %c0_8 = arith.constant 0 : index
      %13 = vector.load %arg2[%c0_7, %c0_8] : memref<2x486xf32, #tpu.memory_space<vmem>>, vector<2x486xf32>
      %14 = arith.truncf %13 : vector<2x486xf32> to vector<2x486xbf16>
      %c0_9 = arith.constant 0 : index
      %c0_10 = arith.constant 0 : index
      %15 = vector.load %arg5[%c0_9, %c0_10] : memref<486x512xbf16, #tpu.memory_space<vmem>>, vector<486x512xbf16>
      %cst_11 = arith.constant dense<0.000000e+00> : vector<2x512xf32>
      %16 = tpu.matmul %14, %15, %cst_11 {dimension_numbers = #tpu.dot_dimension_numbers<[1], [0], [0], [1], [0, 0, 1, 1], [], []>} : vector<2x486xbf16>, vector<486x512xbf16>, vector<2x512xf32> -> vector<2x512xf32>
      %17 = arith.addf %6, %16 : vector<2x512xf32>
      %c0_12 = arith.constant 0 : index
      %c0_13 = arith.constant 0 : index
      %18 = vector.load %arg6[%c0_12, %c0_13] : memref<2x512xf32, #tpu.memory_space<vmem>>, vector<2x512xf32>
      tpu.vector_store %arg6[%c0_12, %c0_13], %17 {strides = array<i32>} : memref<2x512xf32, #tpu.memory_space<vmem>>, vector<2x512xf32>,
    } else {
    }
    %c3_i32_5 = arith.constant 3 : i32
    %10 = arith.cmpi sge, %arg0, %c3_i32_5 : i32
    %11 = arith.extui %10 : i1 to i32
    %c0_i32_6 = arith.constant 0 : i32
    %12 = arith.cmpi ne, %11, %c0_i32_6 : i32
    scf.if %12 {
      %c0_7 = arith.constant 0 : index
      %c0_8 = arith.constant 0 : index
      %13 = vector.load %arg6[%c0_7, %c0_8] : memref<2x512xf32, #tpu.memory_space<vmem>>, vector<2x512xf32>
      tpu.vector_store %arg6[%c0_7, %c0_8], %6 {strides = array<i32>} : memref<2x512xf32, #tpu.memory_space<vmem>>, vector<2x512xf32>,
    } else {
    }
    return
  }
  func.func @transform_0(%arg0: i32) -> (i32, i32) {
    %c0_i32 = arith.constant 0 : i32
    %c0_i32_0 = arith.constant 0 : i32
    %c0_i32_1 = arith.constant 0 : i32
    return %c0_i32, %c0_i32_0 : i32, i32
  }
  func.func @transform_1(%arg0: i32) -> (i32, i32) {
    %c0_i32 = arith.constant 0 : i32
    %c0_i32_0 = arith.constant 0 : i32
    %c0_i32_1 = arith.constant 0 : i32
    return %c0_i32, %c0_i32_0 : i32, i32
  }
  func.func @transform_2(%arg0: i32) -> (i32, i32) {
    %c0_i32 = arith.constant 0 : i32
    %c0_i32_0 = arith.constant 0 : i32
    return %c0_i32, %arg0 : i32, i32
  }
  func.func @transform_3(%arg0: i32) -> (i32, i32) {
    %c0_i32 = arith.constant 0 : i32
    %c0_i32_0 = arith.constant 0 : i32
    return %c0_i32, %arg0 : i32, i32
  }
  func.func @transform_4(%arg0: i32) -> (i32, i32) {
    %c2_i32 = arith.constant 2 : i32
    %0 = arith.minsi %arg0, %c2_i32 : i32
    %c0_i32 = arith.constant 0 : i32
    %c0_i32_0 = arith.constant 0 : i32
    return %c0_i32, %0 : i32, i32
  }
  func.func @transform_5(%arg0: i32) -> (i32, i32) {
    %c0_i32 = arith.constant 0 : i32
    %c0_i32_0 = arith.constant 0 : i32
    return %c0_i32, %arg0 : i32, i32
  }
}

module attributes {stable_mosaic.version = 11 : i64} {
  func.func @_skinning_kernel(%arg0: i32, %arg1: memref<32x55xf32, #tpu.memory_space<vmem>>, %arg2: memref<6x256xf32, #tpu.memory_space<vmem>>, %arg3: memref<55x256xbf16, #tpu.memory_space<vmem>>, %arg4: memref<6x256xf32, #tpu.memory_space<vmem>>) attributes {dimension_semantics = [#tpu.dimension_semantics<parallel>], iteration_bounds = array<i64: 2>, scalar_prefetch = 0 : i64, scratch_operands = 0 : i64, tpu.core_type = #tpu.core_type<tc>, window_params = [{pipeline_mode = #tpu.pipeline_mode<synchronous>, transform_indices = @transform_0, window_bounds = array<i64: 32, 55>}, {transform_indices = @transform_1, window_bounds = array<i64: 6, 256>}, {transform_indices = @transform_2, window_bounds = array<i64: 55, 256>}, {transform_indices = @transform_3, window_bounds = array<i64: 6, 256>}]} {
    %c0 = arith.constant 0 : index
    %c0_0 = arith.constant 0 : index
    %0 = vector.load %arg1[%c0, %c0_0] : memref<32x55xf32, #tpu.memory_space<vmem>>, vector<32x55xf32>
    %1 = arith.truncf %0 : vector<32x55xf32> to vector<32x55xbf16>
    %c0_1 = arith.constant 0 : index
    %c0_2 = arith.constant 0 : index
    %2 = vector.load %arg3[%c0_1, %c0_2] : memref<55x256xbf16, #tpu.memory_space<vmem>>, vector<55x256xbf16>
    %cst = arith.constant dense<0.000000e+00> : vector<32x256xf32>
    %3 = tpu.matmul %1, %2, %cst {dimension_numbers = #tpu.dot_dimension_numbers<[1], [0], [0], [1], [0, 0, 1, 1], [], []>} : vector<32x55xbf16>, vector<55x256xbf16>, vector<32x256xf32> -> vector<32x256xf32>
    %c0_3 = arith.constant 0 : index
    %c0_4 = arith.constant 0 : index
    %4 = vector.load %arg2[%c0_3, %c0_4] : memref<6x256xf32, #tpu.memory_space<vmem>>, vector<6x256xf32>
    %5 = vector.extract_strided_slice %4 {offsets = [0, 0], sizes = [2, 256], strides = [1, 1]} : vector<6x256xf32> to vector<2x256xf32>
    %6 = vector.extract_strided_slice %4 {offsets = [2, 0], sizes = [2, 256], strides = [1, 1]} : vector<6x256xf32> to vector<2x256xf32>
    %7 = vector.extract_strided_slice %4 {offsets = [4, 0], sizes = [2, 256], strides = [1, 1]} : vector<6x256xf32> to vector<2x256xf32>
    %8 = vector.extract_strided_slice %3 {offsets = [0, 0], sizes = [2, 256], strides = [1, 1]} : vector<32x256xf32> to vector<2x256xf32>
    %9 = arith.mulf %8, %5 : vector<2x256xf32>
    %10 = vector.extract_strided_slice %3 {offsets = [2, 0], sizes = [2, 256], strides = [1, 1]} : vector<32x256xf32> to vector<2x256xf32>
    %11 = arith.mulf %10, %6 : vector<2x256xf32>
    %12 = arith.addf %9, %11 : vector<2x256xf32>
    %13 = vector.extract_strided_slice %3 {offsets = [4, 0], sizes = [2, 256], strides = [1, 1]} : vector<32x256xf32> to vector<2x256xf32>
    %14 = arith.mulf %13, %7 : vector<2x256xf32>
    %15 = arith.addf %12, %14 : vector<2x256xf32>
    %16 = vector.extract_strided_slice %3 {offsets = [6, 0], sizes = [2, 256], strides = [1, 1]} : vector<32x256xf32> to vector<2x256xf32>
    %17 = arith.addf %15, %16 : vector<2x256xf32>
    %18 = vector.extract_strided_slice %3 {offsets = [8, 0], sizes = [2, 256], strides = [1, 1]} : vector<32x256xf32> to vector<2x256xf32>
    %19 = arith.mulf %18, %5 : vector<2x256xf32>
    %20 = vector.extract_strided_slice %3 {offsets = [10, 0], sizes = [2, 256], strides = [1, 1]} : vector<32x256xf32> to vector<2x256xf32>
    %21 = arith.mulf %20, %6 : vector<2x256xf32>
    %22 = arith.addf %19, %21 : vector<2x256xf32>
    %23 = vector.extract_strided_slice %3 {offsets = [12, 0], sizes = [2, 256], strides = [1, 1]} : vector<32x256xf32> to vector<2x256xf32>
    %24 = arith.mulf %23, %7 : vector<2x256xf32>
    %25 = arith.addf %22, %24 : vector<2x256xf32>
    %26 = vector.extract_strided_slice %3 {offsets = [14, 0], sizes = [2, 256], strides = [1, 1]} : vector<32x256xf32> to vector<2x256xf32>
    %27 = arith.addf %25, %26 : vector<2x256xf32>
    %28 = vector.extract_strided_slice %3 {offsets = [16, 0], sizes = [2, 256], strides = [1, 1]} : vector<32x256xf32> to vector<2x256xf32>
    %29 = arith.mulf %28, %5 : vector<2x256xf32>
    %30 = vector.extract_strided_slice %3 {offsets = [18, 0], sizes = [2, 256], strides = [1, 1]} : vector<32x256xf32> to vector<2x256xf32>
    %31 = arith.mulf %30, %6 : vector<2x256xf32>
    %32 = arith.addf %29, %31 : vector<2x256xf32>
    %33 = vector.extract_strided_slice %3 {offsets = [20, 0], sizes = [2, 256], strides = [1, 1]} : vector<32x256xf32> to vector<2x256xf32>
    %34 = arith.mulf %33, %7 : vector<2x256xf32>
    %35 = arith.addf %32, %34 : vector<2x256xf32>
    %36 = vector.extract_strided_slice %3 {offsets = [22, 0], sizes = [2, 256], strides = [1, 1]} : vector<32x256xf32> to vector<2x256xf32>
    %37 = arith.addf %35, %36 : vector<2x256xf32>
    %38 = tpu.concatenate %17, %27, %37 in 0 : vector<2x256xf32>, vector<2x256xf32>, vector<2x256xf32> -> vector<6x256xf32>
    %c0_5 = arith.constant 0 : index
    %c0_6 = arith.constant 0 : index
    %39 = vector.load %arg4[%c0_5, %c0_6] : memref<6x256xf32, #tpu.memory_space<vmem>>, vector<6x256xf32>
    tpu.vector_store %arg4[%c0_5, %c0_6], %38 {strides = array<i32>} : memref<6x256xf32, #tpu.memory_space<vmem>>, vector<6x256xf32>,
    return
  }
  func.func @transform_0(%arg0: i32) -> (i32, i32) {
    %c0_i32 = arith.constant 0 : i32
    %c0_i32_0 = arith.constant 0 : i32
    %c0_i32_1 = arith.constant 0 : i32
    return %c0_i32, %c0_i32_0 : i32, i32
  }
  func.func @transform_1(%arg0: i32) -> (i32, i32) {
    %c0_i32 = arith.constant 0 : i32
    %c0_i32_0 = arith.constant 0 : i32
    return %c0_i32, %arg0 : i32, i32
  }
  func.func @transform_2(%arg0: i32) -> (i32, i32) {
    %c0_i32 = arith.constant 0 : i32
    %c0_i32_0 = arith.constant 0 : i32
    return %c0_i32, %arg0 : i32, i32
  }
  func.func @transform_3(%arg0: i32) -> (i32, i32) {
    %c0_i32 = arith.constant 0 : i32
    %c0_i32_0 = arith.constant 0 : i32
    return %c0_i32, %arg0 : i32, i32
  }
}

module attributes {stable_mosaic.version = 11 : i64} {
  func.func @_cam_proj_kernel(%arg0: memref<2x8xf32, #tpu.memory_space<vmem>>, %arg1: memref<2x9xf32, #tpu.memory_space<vmem>>, %arg2: memref<3x2x128xf32, #tpu.memory_space<vmem>>, %arg3: memref<2x3xf32, #tpu.memory_space<vmem>>, %arg4: memref<2x2x128xf32, #tpu.memory_space<vmem>>) attributes {dimension_semantics = [], scalar_prefetch = 0 : i64, scratch_operands = 0 : i64, tpu.core_type = #tpu.core_type<tc>} {
    %c0 = arith.constant 0 : index
    %c0_0 = arith.constant 0 : index
    %0 = vector.load %arg0[%c0, %c0_0] : memref<2x8xf32, #tpu.memory_space<vmem>>, vector<2x8xf32>
    %c0_1 = arith.constant 0 : index
    %c0_2 = arith.constant 0 : index
    %1 = vector.load %arg1[%c0_1, %c0_2] : memref<2x9xf32, #tpu.memory_space<vmem>>, vector<2x9xf32>
    %2 = vector.extract_strided_slice %0 {offsets = [0, 0], sizes = [2, 1], strides = [1, 1]} : vector<2x8xf32> to vector<2x1xf32>
    %3 = vector.extract_strided_slice %0 {offsets = [0, 1], sizes = [2, 1], strides = [1, 1]} : vector<2x8xf32> to vector<2x1xf32>
    %4 = vector.extract_strided_slice %0 {offsets = [0, 2], sizes = [2, 1], strides = [1, 1]} : vector<2x8xf32> to vector<2x1xf32>
    %5 = vector.extract_strided_slice %0 {offsets = [0, 3], sizes = [2, 1], strides = [1, 1]} : vector<2x8xf32> to vector<2x1xf32>
    %cst = arith.constant 2.000000e+02 : f32
    %6 = vector.broadcast %cst : f32 to vector<2x1xf32>
    %7 = arith.mulf %5, %6 : vector<2x1xf32>
    %8 = vector.extract_strided_slice %0 {offsets = [0, 4], sizes = [2, 1], strides = [1, 1]} : vector<2x8xf32> to vector<2x1xf32>
    %9 = vector.extract_strided_slice %0 {offsets = [0, 5], sizes = [2, 1], strides = [1, 1]} : vector<2x8xf32> to vector<2x1xf32>
    %10 = vector.extract_strided_slice %0 {offsets = [0, 6], sizes = [2, 1], strides = [1, 1]} : vector<2x8xf32> to vector<2x1xf32>
    %11 = vector.extract_strided_slice %0 {offsets = [0, 7], sizes = [2, 1], strides = [1, 1]} : vector<2x8xf32> to vector<2x1xf32>
    %12 = vector.extract_strided_slice %1 {offsets = [0, 0], sizes = [2, 1], strides = [1, 1]} : vector<2x9xf32> to vector<2x1xf32>
    %cst_3 = arith.constant 2.240000e+02 : f32
    %13 = vector.broadcast %cst_3 : f32 to vector<2x1xf32>
    %14 = arith.divf %7, %13 : vector<2x1xf32>
    %cst_4 = arith.constant 2.000000e+00 : f32
    %15 = vector.broadcast %cst_4 : f32 to vector<2x1xf32>
    %16 = arith.mulf %15, %12 : vector<2x1xf32>
    %cst_5 = arith.constant 2.240000e+02 : f32
    %17 = vector.broadcast %cst_5 : f32 to vector<2x1xf32>
    %18 = arith.mulf %14, %17 : vector<2x1xf32>
    %19 = arith.mulf %18, %2 : vector<2x1xf32>
    %20 = arith.divf %16, %19 : vector<2x1xf32>
    %21 = arith.mulf %2, %7 : vector<2x1xf32>
    %cst_6 = arith.constant 1.000000e+00 : f32
    %22 = vector.broadcast %cst_6 : f32 to vector<2x1xf32>
    %23 = arith.divf %22, %21 : vector<2x1xf32>
    %cst_7 = arith.constant 2.000000e+00 : f32
    %24 = vector.broadcast %cst_7 : f32 to vector<2x1xf32>
    %25 = arith.divf %10, %24 : vector<2x1xf32>
    %26 = arith.subf %8, %25 : vector<2x1xf32>
    %cst_8 = arith.constant 2.000000e+00 : f32
    %27 = vector.broadcast %cst_8 : f32 to vector<2x1xf32>
    %28 = arith.mulf %27, %26 : vector<2x1xf32>
    %29 = arith.mulf %28, %23 : vector<2x1xf32>
    %30 = arith.addf %3, %29 : vector<2x1xf32>
    %cst_9 = arith.constant 2.000000e+00 : f32
    %31 = vector.broadcast %cst_9 : f32 to vector<2x1xf32>
    %32 = arith.divf %11, %31 : vector<2x1xf32>
    %33 = arith.subf %9, %32 : vector<2x1xf32>
    %cst_10 = arith.constant 2.000000e+00 : f32
    %34 = vector.broadcast %cst_10 : f32 to vector<2x1xf32>
    %35 = arith.mulf %34, %33 : vector<2x1xf32>
    %36 = arith.mulf %35, %23 : vector<2x1xf32>
    %37 = arith.addf %4, %36 : vector<2x1xf32>
    %38 = tpu.concatenate %30, %37, %20 in 1 : vector<2x1xf32>, vector<2x1xf32>, vector<2x1xf32> -> vector<2x3xf32>
    %c0_11 = arith.constant 0 : index
    %c0_12 = arith.constant 0 : index
    %39 = vector.load %arg3[%c0_11, %c0_12] : memref<2x3xf32, #tpu.memory_space<vmem>>, vector<2x3xf32>
    tpu.vector_store %arg3[%c0_11, %c0_12], %38 {strides = array<i32>} : memref<2x3xf32, #tpu.memory_space<vmem>>, vector<2x3xf32>,
    %c0_13 = arith.constant 0 : index
    %c0_14 = arith.constant 0 : index
    %c0_15 = arith.constant 0 : index
    %40 = vector.load %arg2[%c0_13, %c0_14, %c0_15] : memref<3x2x128xf32, #tpu.memory_space<vmem>>, vector<3x2x128xf32>
    %41 = vector.extract_strided_slice %40 {offsets = [0, 0, 0], sizes = [1, 2, 128], strides = [1, 1, 1]} : vector<3x2x128xf32> to vector<1x2x128xf32>
    %42 = vector.shape_cast %41 : vector<1x2x128xf32> to vector<2x128xf32>
    %43 = vector.broadcast %30 : vector<2x1xf32> to vector<2x128xf32>
    %44 = arith.addf %42, %43 : vector<2x128xf32>
    %45 = vector.extract_strided_slice %40 {offsets = [1, 0, 0], sizes = [1, 2, 128], strides = [1, 1, 1]} : vector<3x2x128xf32> to vector<1x2x128xf32>
    %46 = vector.shape_cast %45 : vector<1x2x128xf32> to vector<2x128xf32>
    %47 = vector.broadcast %37 : vector<2x1xf32> to vector<2x128xf32>
    %48 = arith.addf %46, %47 : vector<2x128xf32>
    %49 = vector.extract_strided_slice %40 {offsets = [2, 0, 0], sizes = [1, 2, 128], strides = [1, 1, 1]} : vector<3x2x128xf32> to vector<1x2x128xf32>
    %50 = vector.shape_cast %49 : vector<1x2x128xf32> to vector<2x128xf32>
    %51 = vector.broadcast %20 : vector<2x1xf32> to vector<2x128xf32>
    %52 = arith.addf %50, %51 : vector<2x128xf32>
    %cst_16 = arith.constant 1.000000e+00 : f32
    %53 = vector.broadcast %cst_16 : f32 to vector<2x128xf32>
    %54 = arith.divf %53, %52 : vector<2x128xf32>
    %55 = arith.mulf %44, %54 : vector<2x128xf32>
    %56 = arith.mulf %48, %54 : vector<2x128xf32>
    %57 = vector.extract_strided_slice %1 {offsets = [0, 0], sizes = [2, 1], strides = [1, 1]} : vector<2x9xf32> to vector<2x1xf32>
    %58 = vector.broadcast %57 : vector<2x1xf32> to vector<2x128xf32>
    %59 = arith.mulf %58, %55 : vector<2x128xf32>
    %60 = vector.extract_strided_slice %1 {offsets = [0, 1], sizes = [2, 1], strides = [1, 1]} : vector<2x9xf32> to vector<2x1xf32>
    %61 = vector.broadcast %60 : vector<2x1xf32> to vector<2x128xf32>
    %62 = arith.mulf %61, %56 : vector<2x128xf32>
    %63 = arith.addf %59, %62 : vector<2x128xf32>
    %64 = vector.extract_strided_slice %1 {offsets = [0, 2], sizes = [2, 1], strides = [1, 1]} : vector<2x9xf32> to vector<2x1xf32>
    %65 = vector.broadcast %64 : vector<2x1xf32> to vector<2x128xf32>
    %66 = arith.addf %63, %65 : vector<2x128xf32>
    %67 = vector.extract_strided_slice %1 {offsets = [0, 3], sizes = [2, 1], strides = [1, 1]} : vector<2x9xf32> to vector<2x1xf32>
    %68 = vector.broadcast %67 : vector<2x1xf32> to vector<2x128xf32>
    %69 = arith.mulf %68, %55 : vector<2x128xf32>
    %70 = vector.extract_strided_slice %1 {offsets = [0, 4], sizes = [2, 1], strides = [1, 1]} : vector<2x9xf32> to vector<2x1xf32>
    %71 = vector.broadcast %70 : vector<2x1xf32> to vector<2x128xf32>
    %72 = arith.mulf %71, %56 : vector<2x128xf32>
    %73 = arith.addf %69, %72 : vector<2x128xf32>
    %74 = vector.extract_strided_slice %1 {offsets = [0, 5], sizes = [2, 1], strides = [1, 1]} : vector<2x9xf32> to vector<2x1xf32>
    %75 = vector.broadcast %74 : vector<2x1xf32> to vector<2x128xf32>
    %76 = arith.addf %73, %75 : vector<2x128xf32>
    %77 = vector.shape_cast %66 : vector<2x128xf32> to vector<1x2x128xf32>
    %78 = vector.shape_cast %76 : vector<2x128xf32> to vector<1x2x128xf32>
    %79 = tpu.concatenate %77, %78 in 0 : vector<1x2x128xf32>, vector<1x2x128xf32> -> vector<2x2x128xf32>
    %c0_17 = arith.constant 0 : index
    %c0_18 = arith.constant 0 : index
    %c0_19 = arith.constant 0 : index
    %80 = vector.load %arg4[%c0_17, %c0_18, %c0_19] : memref<2x2x128xf32, #tpu.memory_space<vmem>>, vector<2x2x128xf32>
    tpu.vector_store %arg4[%c0_17, %c0_18, %c0_19], %79 {strides = array<i32>} : memref<2x2x128xf32, #tpu.memory_space<vmem>>, vector<2x2x128xf32>,
    return
  }
}

</mosaic_0001>

<bundles_post_ra>
// kernel: _lambda_.3
= control target key start
LH: loop header
LB: loop body
LE: loop exit
PB: predicated region body
PF: predicated region fallthrough
CT: control target
= control target key end

     0   :  { %s2755_s0 = inlined_call_operand.hbm [shape: f32[2,11], index: 0, kind: input, shape index: {}]   ;;  %s2756_s1 = inlined_call_operand.vmem [shape: f32[2,486], index: 1, kind: input, shape index: {}]   ;;  %s2757_s2 = inlined_call_operand.hbm [shape: f32[1,2048], index: 2, kind: input, shape index: {}]   ;;  %s2758_s3 = inlined_call_operand.hbm [shape: bf16[11,2048], index: 3, kind: input, shape index: {}]   ;;  %s2759_s4 = inlined_call_operand.hbm [shape: bf16[486,1536], index: 4, kind: input, shape index: {}]   ;;  %s2760_s5 = inlined_call_operand.vmem [shape: f32[2,2048], index: 5, kind: output, shape index: {}]  }
   0x1   :  { %2770 = sst [smem:[#allocation13_spill]] %s2755_s0 }
   0x2   :  { %2771 = sst [smem:[#allocation14_spill]] %s2757_s2 }
   0x3   :  { %10 = vsyncpa [#allocation3], 0 }
   0x4   :  { %11 = vsyncpa [#allocation5], 0 }
   0x5   :  { %13 = vsyncpa [#allocation5 + $0x1], 0 }
   0x6   :  { %14 = vsyncpa [#allocation8], 0 }
   0x7   :  { %16 = vsyncpa [#allocation8 + $0x1], 0  ;;  %s2289_s18 = smov 0   ;;  %s2291_s19 = smov 0  }
   0x8   :  { %s2293_s20 = smov 0   ;;  %s2295_s21 = smov 0  }
   0x9   :  { %s2297_s22 = smov 0   ;;  %s2299_s23 = smov 0  }
   0xa   :  { %s2301_s24 = smov 0  }
   0xb LB: > { %s2325_s25 = sadd.s32 1, %s2245_s24   ;;  %s71_s26 = sadd.s32 1, %s2241_s23  ;;  %s2245_s24 = sphi %s2301_s24, %s2800_s24   ;;  %s2241_s23 = sphi %s2299_s23, %s2799_s23   ;;  %s2237_s22 = sphi %s2297_s22, %s2798_s22   ;;  %s2233_s21 = sphi %s2295_s21, %s2797_s21   ;;  %s2229_s20 = sphi %s2293_s20, %s2796_s20   ;;  %s2225_s19 = sphi %s2291_s19, %s2795_s19   ;;  %s2221_s18 = sphi %s2289_s18, %s2794_s18  }
   0xc   : > { %s68_s27 = ssub.s32 %s2245_s24, %s2325_s25  ;;  %p78_p0 = scmp.ne.s32.totalorder %s2241_s23, %s2237_s22 }
   0xd   : > { %p69_p1 = scmp.eq.s32.totalorder %s68_s27, 0  ;;  %p79_p2 = scmp.eq.s32.totalorder %s2245_s24, 0 }
   0xe   : > { %p134_p3 = scmp.ne.s32.totalorder %s2229_s20, %s2225_s19  ;;  %p2761_p6 = scmp.lt.s32.totalorder %s2245_s24, 4 }
   0xf   : > { %s2336_s28 = scalar_select %p69_p1, %s2241_s23, %s71_s26  }
  0x10   : > { %p80_p4 = por %p79_p2, %p78_p0  ;;  %p2338_p5 = por %p134_p3, %p79_p2 }
  0x11   : > { %2772 = sst [smem:[#allocation12_spill]] %s2336_s28  ;;  %s204_s30 = sand.u32 1, %s2245_s24  }
  0x12   : > { %s206_s6 = sand.u32 1, %s2241_s23   ;;  %s1773_s8 = sshll.u32 %s2245_s24, 6 }
  0x13   : > { %s1621_s7 = sshll.u32 %s206_s6, 2  ;;  %s2774_s2 = sld [smem:[#allocation14_spill]] }
  0x14   : > { %s208_s12 = scalar_lea.vmem [#allocation4], %s1621_s7  ;;  %p2353_p7 = pnand %p2761_p6, %p80_p4 }
  0x15   : > { %s216_s13 = sshll.u32 %s208_s12, 4  ;;  %s2359_s15 = sshll.u32 %s206_s6, 5  ;;  %s2357_s13 = int_to_ptr.vmem [resolvable:$true] %s216_s13 }
  0x16   : > { %s2775_s14 = scalar_select %p2353_p7, 1, 0 }
  0x17   : > { %s2361_s16 = scalar_lea.sflag [#allocation5], %s204_s30  ;;  %p2763_p9 = pneg %p2353_p7 }
  0x19   : > { %s2349_s11 = scalar_lea.hbm %s2774_s2, %s1773_s8  ;;  %s2066_s7 = scalar_lea.hbm %s2774_s2, 256 }
  0x1a   : > { %s2061_s17 = scalar_lea.hbm %s2349_s11, 64  ;;  %p2067_p12 = scmp.lt.u32.totalorder %s2349_s11, %s2774_s2 }
  0x1b   : > { %p2062_p8 = scmp.ne.s32.totalorder %s2349_s11, %s2061_s17  ;;  %p2068_p13 = scmp.lt.u32.totalorder %s2066_s7, %s2061_s17 }
  0x1c   : > { %p2070_p1 = scmp.lt.u32.totalorder %s2061_s17, %s2349_s11 }
  0x1d   : > { %p2064_p10 = pnand %p2763_p9, %p2062_p8  ;;  %p2069_p0 = por %p2068_p13, %p2067_p12 }
  0x1f   : > { %p2065_p11 = pneg %p2064_p10  ;;  %p2071_p2 = por %p2070_p1, %p2069_p0 }
  0x21   : > { %p2072_p3 = pnand %p2071_p2, %p2065_p11 }
  0x23   : > { %2075 = shalt.err (!%p2072_p3)
}
  0x24   : > { %s2076_s30 = scalar_lea.vmem %s2357_s13, 64  ;;  %s2247_s6 = smov [#allocation4]  }
  0x25   : > { %p2077_p4 = scmp.ne.s32.totalorder %s2357_s13, %s2076_s30  ;;  %s2081_s10 = sshll.u32 %s2247_s6, 4  ;;  %s2082_s10 = int_to_ptr.vmem [resolvable:$false] %s2081_s10 }
  0x26   : > { %s2083_s12 = scalar_lea.vmem %s2082_s10, 128  ;;  %p2084_p6 = scmp.lt.s32.totalorder %s2357_s13, %s2082_s10 }
  0x27   : > { %p2079_p8 = pnand %p2077_p4, %p2763_p9  ;;  %p2085_p12 = scmp.lt.s32.totalorder %s2083_s12, %s2076_s30 }
  0x29   : > { %p2080_p10 = pneg %p2079_p8  ;;  %p2086_p13 = por %p2085_p12, %p2084_p6 }
  0x2b   : > { %p2087_p0 = pnand %p2086_p13, %p2080_p10 }
  0x2d   : > { %2090 = shalt.err (!%p2087_p0)
}
  0x2e   : > { %1795 = dma.hbm_to_vmem [thread:$0]  (!%p2353_p7), %s2349_s11, 64, %s2357_s13, %s2361_s16  }
  0x2f   : > { %s227_s17 = scalar_lea.vmem [#allocation6], %s2359_s15  ;;  %p2776_p6 = scmp.lt.s32.totalorder %s2245_s24, 4 }
  0x30   : > { %s234_s26 = sshll.u32 %s227_s17, 4  ;;  %s2401_s7 = sadd.s32 4294967295, %s2245_s24   ;;  %s2398_s26 = int_to_ptr.vmem [resolvable:$true] %s234_s26 }
  0x31   : > { %p2394_p11 = pnand %p2776_p6, %p2338_p5  ;;  %p84_p1 = scmp.ne.s32.totalorder %s2237_s22, %s2233_s21 }
  0x32   : > { %p2762_p2 = scmp.eq.s32.totalorder %s2401_s7, 0  ;;  %p140_p3 = scmp.ne.s32.totalorder %s2225_s19, %s2221_s18 }
  0x33   : > { %s2777_s27 = scalar_select %p2394_p11, 1, 0 }
  0x34   : > { %p1618_p4 = scmp.ge.s32.totalorder %s2245_s24, 1  ;;  %p177_p8 = scmp.lt.s32.totalorder %s2245_s24, 5 }
  0x35   : > { %p2412_p10 = por %p2762_p2, %p84_p1  ;;  %p2418_p5 = por %p140_p3, %p2762_p2 }
  0x36   : > { %p2422_p12 = pnand %p1618_p4, %p177_p8  ;;  %s1774_s21 = sshll.u32 %s2245_s24, 8 }
  0x37   : > { %s2778_s29 = scalar_select %p2412_p10, 1, 0 }
  0x38   : > { %s2779_s11 = scalar_select %p2418_p5, 1, 0 }
  0x39   : > { %s2780_s13 = scalar_select %p2422_p12, 1, 0 }
  0x3a   : > { %p1788_p13 = pneg %p2422_p12  ;;  %s2248_s18 = smov [#allocation2]  }
  0x3b   : > { %s190_s15 = sshll.u32 %s2248_s18, 4  ;;  %s2432_s30 = scalar_lea.hbm %s2758_s3, %s1774_s21  ;;  %s191_s15 = int_to_ptr.vmem [resolvable:$true] %s190_s15 }
  0x3c   : > { %p2436_p0 = pnand %p1788_p13, %p2762_p2  ;;  %s2782_s0 = sld [smem:[#allocation13_spill]] }
  0x3e   : > { %p2093_p3 = pneg %p2436_p0 }
  0x42   : > { %s2091_s17 = scalar_lea.hbm %s2782_s0, 32 }
  0x43   : > { %p2092_p1 = scmp.ne.s32.totalorder %s2782_s0, %s2091_s17  ;;  %p2098_p13 = scmp.lt.u32.totalorder %s2091_s17, %s2782_s0 }
  0x45   : > { %p2094_p4 = pnand %p2093_p3, %p2092_p1 }
  0x47   : > { %p2095_p8 = pneg %p2094_p4 }
  0x49   : > { %p2100_p2 = pnand %p2098_p13, %p2095_p8 }
  0x4b   : > { %2103 = shalt.err (!%p2100_p2)
}
  0x4c   : > { %s2104_s8 = scalar_lea.vmem %s191_s15, 32  ;;  %p2112_p10 = scmp.lt.s32.totalorder %s191_s15, %s191_s15 }
  0x4d   : > { %p2105_p6 = scmp.ne.s32.totalorder %s191_s15, %s2104_s8  ;;  %p2113_p12 = scmp.lt.s32.totalorder %s2104_s8, %s2104_s8 }
  0x4f   : > { %p2107_p9 = pnand %p2105_p6, %p2093_p3  ;;  %p2114_p11 = por %p2113_p12, %p2112_p10 }
  0x51   : > { %p2108_p5 = pneg %p2107_p9 }
  0x53   : > { %p2115_p7 = pnand %p2114_p11, %p2108_p5 }
  0x55   : > { %2118 = shalt.err (!%p2115_p7)
}
  0x56   : > { %1791 = dma.hbm_to_vmem [thread:$0]  (!%p2436_p0), %s2782_s0, 32, %s191_s15, [#allocation3]  }
  0x57   : > { %s2119_s9 = scalar_lea.hbm %s2432_s30, 512  ;;  %p2783_p6 = scmp.ne.s32.totalorder %s2775_s14, 0 }
  0x58   : > { %p2120_p2 = scmp.ne.s32.totalorder %s2432_s30, %s2119_s9  ;;  %s2124_s17 = scalar_lea.hbm %s2758_s3, 2048 }
  0x59   : > { %p2784_p9 = pneg %p2783_p6  ;;  %p2125_p7 = scmp.lt.u32.totalorder %s2432_s30, %s2758_s3 }
  0x5a   : > { %p2126_p11 = scmp.lt.u32.totalorder %s2124_s17, %s2119_s9  ;;  %p2128_p5 = scmp.lt.u32.totalorder %s2119_s9, %s2432_s30 }
  0x5b   : > { %p2122_p1 = pnand %p2120_p2, %p2784_p9 }
  0x5c   : > { %p2127_p10 = por %p2126_p11, %p2125_p7 }
  0x5d   : > { %p2123_p3 = pneg %p2122_p1 }
  0x5e   : > { %p2129_p12 = por %p2128_p5, %p2127_p10 }
  0x60   : > { %p2130_p4 = pnand %p2129_p12, %p2123_p3 }
  0x62   : > { %2133 = shalt.err (!%p2130_p4)
}
  0x63   : > { %s2134_s15 = scalar_lea.vmem %s2398_s26, 512  ;;  %p2785_p8 = pmov %p2784_p9 }
  0x64   : > { %p2135_p0 = scmp.ne.s32.totalorder %s2398_s26, %s2134_s15  ;;  %s2249_s18 = smov [#allocation6]  }
  0x65   : > { %s2139_s8 = sshll.u32 %s2249_s18, 4  ;;  %s2140_s8 = int_to_ptr.vmem [resolvable:$false] %s2139_s8 }
  0x66   : > { %p2137_p13 = pnand %p2135_p0, %p2785_p8  ;;  %s2141_s2 = scalar_lea.vmem %s2140_s8, 1024 }
  0x67   : > { %p2142_p9 = scmp.lt.s32.totalorder %s2398_s26, %s2140_s8  ;;  %p2143_p1 = scmp.lt.s32.totalorder %s2141_s2, %s2134_s15 }
  0x68   : > { %p2138_p2 = pneg %p2137_p13 }
  0x69   : > { %p2144_p7 = por %p2143_p1, %p2142_p9 }
  0x6b   : > { %p2145_p11 = pnand %p2144_p7, %p2138_p2 }
  0x6d   : > { %2148 = shalt.err (!%p2145_p11)
}
  0x6e   : > { %s2250_s28 = smov 1024   ;;  %s2251_s9 = smov 256  }
  0x6f   : > { %s2252_s10 = smov 16   ;;  %p2786_p3 = scmp.lt.s32.totalorder %s2245_s24, 2 }
  0x70   : > { %1798 = dma.hbm_to_vmem [thread:$0]  (!%p2783_p6), %s2432_s30, 512, %s2398_s26, %s2361_s16, %s2250_s28, %s2251_s9, %s2252_s10  }
  0x71   : > { %s2802_s24 = smov (!%p2786_p3, %s2245_s24), 2  ;;  %p122_p10 = scmp.lt.s32.totalorder %s2325_s25, 2 }
  0x72   : > { %s127_s12 = sadd.s32 1, %s2229_s20  ;;  %s244_s17 = sand.u32 1, %s2229_s20  }
  0x73   : > { %s1775_s6 = sshll.u32 %s2802_s24, 8  ;;  %s1776_s15 = smul.u32 976, %s244_s17 }
  0x74   : > { %s123_s21 = scalar_select %p122_p10, %s2325_s25, 2 }
  0x75   : > { %s2493_s0 = scalar_lea.hbm %s2759_s4, %s1775_s6  ;;  %s248_s14 = scalar_lea.vmem [#allocation7], %s1776_s15 }
  0x76   : > { %s124_s18 = ssub.s32 %s2802_s24, %s123_s21  ;;  %s257_s16 = sshll.u32 %s248_s14, 4  ;;  %s2498_s16 = int_to_ptr.vmem [resolvable:$true] %s257_s16 }
  0x77   : > { %p125_p6 = scmp.eq.s32.totalorder %s124_s18, 0  ;;  %s2500_s30 = scalar_lea.sflag [#allocation8], %s244_s17 }
  0x78   : > { %s2149_s28 = scalar_lea.hbm %s2493_s0, 15616  ;;  %p2787_p12 = scmp.ne.s32.totalorder %s2777_s27, 0 }
  0x79   : > { %s2496_s26 = scalar_select %p125_p6, %s2229_s20, %s127_s12  }
  0x7a   : > { %p2150_p5 = scmp.ne.s32.totalorder %s2493_s0, %s2149_s28  ;;  %p2151_p4 = pneg %p2787_p12 }
  0x7b   : > { %s2154_s21 = scalar_lea.hbm %s2759_s4, 46848  ;;  %p2155_p13 = scmp.lt.u32.totalorder %s2493_s0, %s2759_s4 }
  0x7c   : > { %p2152_p0 = pnand %p2151_p4, %p2150_p5  ;;  %p2156_p2 = scmp.lt.u32.totalorder %s2154_s21, %s2149_s28 }
  0x7d   : > { %p2158_p1 = scmp.lt.u32.totalorder %s2149_s28, %s2493_s0 }
  0x7e   : > { %p2153_p8 = pneg %p2152_p0  ;;  %p2157_p9 = por %p2156_p2, %p2155_p13 }
  0x80   : > { %p2159_p7 = por %p2158_p1, %p2157_p9 }
  0x82   : > { %p2160_p11 = pnand %p2159_p7, %p2153_p8 }
  0x84   : > { %2163 = shalt.err (!%p2160_p11)
}
  0x85   : > { %s2164_s12 = scalar_lea.vmem %s2498_s16, 15616  ;;  %s2253_s17 = smov [#allocation7]  }
  0x86   : > { %p2165_p3 = scmp.ne.s32.totalorder %s2498_s16, %s2164_s12  ;;  %s2169_s8 = sshll.u32 %s2253_s17, 4  ;;  %s2170_s8 = int_to_ptr.vmem [resolvable:$false] %s2169_s8 }
  0x87   : > { %s2171_s2 = scalar_lea.vmem %s2170_s8, 31232  ;;  %p2172_p5 = scmp.lt.s32.totalorder %s2498_s16, %s2170_s8 }
  0x88   : > { %p2167_p10 = pnand %p2165_p3, %p2151_p4  ;;  %p2173_p0 = scmp.lt.s32.totalorder %s2171_s2, %s2164_s12 }
  0x8a   : > { %p2168_p6 = pneg %p2167_p10  ;;  %p2174_p13 = por %p2173_p0, %p2172_p5 }
  0x8c   : > { %p2175_p2 = pnand %p2174_p13, %p2168_p6 }
  0x8e   : > { %2178 = shalt.err (!%p2175_p2)
}
  0x8f   : > { %s2254_s14 = smov 768   ;;  %p2788_p4 = scmp.ne.s32.totalorder %s2780_s13, 0 }
  0x90   : > { %1801 = dma.hbm_to_vmem [thread:$0]  (!%p2787_p12), %s2493_s0, 15616, %s2498_s16, %s2500_s30, %s2254_s14, %s2251_s9, %s2252_s10  }
  0x91   : > { %269 = sbr.rel (%p2788_p4) target bundleno = 706 (0x2c2), region = 40  ;;  %p2789_p8 = scmp.eq.s32.totalorder (!%p2788_p4), %s2401_s7, 0 }
  0x98   : > { %2208 = dma.done.wait (%p2789_p8), [#allocation3], 32   ;;  %p2790_p9 = pmov %p2789_p8 }
  0x99   : > { %s275_s28 = sand.u32 1, %s2401_s7   ;;  %s277_s27 = sand.u32 1, %s2237_s22  }
  0x9a   : > { %2210 = vsyncadd (%p2790_p9), [#allocation3], 4294967264  ;;  %s2538_s24 = sshll.u32 %s277_s27, 2  ;;  %s276_s6 = scalar_lea.sflag [#allocation5], %s275_s28 }
  0x9b   : > { %s279_s21 = scalar_lea.vmem [#allocation4], %s2538_s24  ;;  %p2791_p12 = scmp.ne.s32.totalorder %s2778_s29, 0 }
  0x9d   : > { %2212 = dma.done.wait (%p2791_p12), %s276_s6, 576  }
  0x9e   : > { %2214 = vsyncadd (%p2791_p12), %s276_s6, 4294966720  ;;  %s1632_s0 = sshll.u32 %s277_s27, 5  ;;  %s293_s13 = sand.u32 1, %s2225_s19  }
  0x9f   : > { %s1777_s9 = smul.u32 976, %s293_s13  ;;  %s288_s10 = scalar_lea.vmem [#allocation6], %s1632_s0 }
  0xa0   : > { %s294_s16 = scalar_lea.sflag [#allocation8], %s293_s13  ;;  %p2792_p1 = scmp.ne.s32.totalorder %s2779_s11, 0 }
  0xa1   : > { %s2546_s30 = scalar_lea.vmem [#allocation7], %s1777_s9 }
  0xa2   : > { %2216 = dma.done.wait (%p2792_p1), %s294_s16, 15616  }
  0xa3   : > { %2218 = vsyncadd (%p2792_p1), %s294_s16, 4294951680  ;;  %s1633_s15 = sshll.u32 %s2401_s7, 2  ;;  %vm373_vm0 = vcmask 1044480   ;;  %v2255_v0 = vmov 0   ;;  %vm374_vm1 = vcmask 1045504   ;;  %v2256_v1 = vmov 65535  }
  0xa4   : > { %p340_p7 = scmp.lt.s32.totalorder %s1633_s15, 15  ;;  %421 = vmatprep.mubr.bf16.mxu0 %v2255_v0  ;;  %462 = vmatprep.mubr.bf16.mxu1 %v2255_v0  ;;  %v375_v2 = vsel %vm373_vm0, 4294967295, %v2256_v1  ;;  %v1870_v4 = vld [vmem:[%s288_s10 + $0x4] ss:$16 sps:$4 sm:$0x3f]   ;;  %vm369_vm2 = vcmask 89088   ;;  %v472_v14 = vlaneseq }
  0xa5   : > { %v376_v3 = vsel %vm374_vm1, %v375_v2, 0  ;;  %v1872_v5 = vld [vmem:[%s288_s10 + $0xc] ss:$16 sps:$4 sm:$0x3f]   ;;  %v346_v10 = vld [vmem:[#allocation2] sm:$0x3] }
  0xa6   : > { %s2804_s15 = smov (!%p340_p7, %s1633_s15), 15  ;;  %v381_v6 = vand.u32 %v1870_v4, %v376_v3  ;;  %v1874_v7 = vld [vmem:[%s288_s10] ss:$16 sps:$4 sm:$0x3f]   ;;  %v387_v9 = vand.u32 %v1872_v5, %v376_v3  ;;  %v347_v13 = vpack.c.bf16 %v346_v10, %v346_v10  ;;  %v2558_v15 = vshrl.u32 %v472_v14, 7  ;;  %p1641_p11 = scmp.ge.s32.totalorder %s2401_s7, 3 }
  0xa7   : > { %s1634_s29 = sshll.u32 %s2804_s15, 1  ;;  %v1875_v8 = vld [vmem:[%s288_s10 + $0x8] ss:$16 sps:$4 sm:$0x3f]   ;;  %v378_v11 = vand.u32 %v1874_v7, %v376_v3  ;;  %v1876_v37 = vld [vmem:[%s2546_s30 + $0x4] ss:$16 sps:$4 sm:$0xff] (!%p1641_p11)  }
  0xa8   : > { %s2556_s17 = scalar_lea.vmem %s2760_s5, %s1634_s29  ;;  %389 = vmatprep.subr.bf16.mxu0 %v381_v6  ;;  %v384_v12 = vand.u32 %v1875_v8, %v376_v3  ;;  %430 = vmatprep.subr.bf16.mxu1 %v387_v9  ;;  %v474_v16 = vsub.s32 0, %v2558_v15  ;;  %v482_v17 = vsub.s32 2, %v2558_v15  ;;  %v348_v18 = vld [vmem:[%s279_s21] sm:$0xf]  ;;  %v478_v19 = vsub.s32 1, %v2558_v15 }
  0xa9   : > { %390 = vmatpush1.bf16.msra.mxu0 %v378_v11  ;;  %v486_v20 = vsub.s32 3, %v2558_v15  ;;  %v1878_v38 = vld [vmem:[%s2546_s30 + $0x204] ss:$16 sps:$4 sm:$0xff] (!%p1641_p11)   ;;  %v1880_v39 = vld [vmem:[%s2546_s30] ss:$16 sps:$4 sm:$0xff] (!%p1641_p11)   ;;  %vm1259_vm3 = vcmask (!%p1641_p11), 834560  }
  0xaa   : > { %431 = vmatpush1.bf16.msra.mxu1 %v384_v12  ;;  %v475_v21 = vrot.slane %v348_v18, %v474_v16  ;;  %v483_v22 = vrot.slane %v348_v18, %v482_v17  ;;  %v479_v23 = vrot.slane %v348_v18, %v478_v19  ;;  %1276 = vmatprep.subr.bf16.mxu0 (!%p1641_p11), %v1876_v37  ;;  %v1881_v40 = vld [vmem:[%s2546_s30 + $0x200] ss:$16 sps:$4 sm:$0xff] (!%p1641_p11)   ;;  %v1882_v41 = vld [vmem:[%s2546_s30 + $0x24] ss:$16 sps:$4 sm:$0xff] (!%p1641_p11)   ;;  %v2257_v7 = vmov (!%p1641_p11), 1983009808  }
  0xab   : > { %v487_v24 = vrot.slane %v348_v18, %v486_v20  ;;  %1317 = vmatprep.subr.bf16.mxu1 (!%p1641_p11), %v1878_v38  ;;  %v1884_v42 = vld [vmem:[%s2546_s30 + $0x224] ss:$16 sps:$4 sm:$0xff] (!%p1641_p11)   ;;  %v1886_v43 = vld [vmem:[%s2546_s30 + $0x20] ss:$16 sps:$4 sm:$0xff] (!%p1641_p11)   ;;  %v504_v8 = vunpack.c.l.s4 (!%p1641_p11), %v2257_v7  ;;  %vm1263_vm4 = vcmask (!%p1641_p11), 1042432  }
  0xac   : > { %1639 = vmatmul.mubr.msk.bf16.vlgmr.msra.gmra.mrb[0].mxu0 %vm369_vm2, %v347_v13  ;;  %v1887_v44 = vld [vmem:[%s2546_s30 + $0x220] ss:$16 sps:$4 sm:$0xff] (!%p1641_p11)   ;;  %v1888_v45 = vld [vmem:[%s2546_s30 + $0x44] ss:$16 sps:$4 sm:$0xff] (!%p1641_p11)   ;;  %v1995_v7 = vld [vmem:[%s2546_s30 + $0x26c] ss:$16 sps:$4 sm:$0xff] (!%p1641_p11)  }
  0xad   : > { %1640 = vmatmul.mubr.msk.bf16.vlgmr.msra.gmra.mrb[0].mxu1 %vm369_vm2, %v347_v13  ;;  %1277 = vmatpush1.bf16.msra.mxu0 (!%p1641_p11), %v1880_v39  ;;  %v1890_v46 = vld [vmem:[%s2546_s30 + $0x244] ss:$16 sps:$4 sm:$0xff] (!%p1641_p11)   ;;  %v1892_v47 = vld [vmem:[%s2546_s30 + $0x40] ss:$16 sps:$4 sm:$0xff] (!%p1641_p11)   ;;  %v505_v13 = vunpack.c.0.s8 (!%p1641_p11), %v504_v8  ;;  %v1990_v8 = vld [vmem:[%s2546_s30 + $0x88] ss:$16 sps:$4 sm:$0xff] (!%p1641_p11)  }
  0xae   : > { %1318 = vmatpush1.bf16.msra.mxu1 (!%p1641_p11), %v1881_v40  ;;  %1278 = vmatprep.subr.bf16.mxu0 (!%p1641_p11), %v1882_v41  ;;  %v1893_v48 = vld [vmem:[%s2546_s30 + $0x240] ss:$16 sps:$4 sm:$0xff] (!%p1641_p11)   ;;  %v1894_v49 = vld [vmem:[%s2546_s30 + $0x64] ss:$16 sps:$4 sm:$0xff] (!%p1641_p11)  }
  0xaf   : > { %1319 = vmatprep.subr.bf16.mxu1 (!%p1641_p11), %v1884_v42  ;;  %v1896_v50 = vld [vmem:[%s2546_s30 + $0x264] ss:$16 sps:$4 sm:$0xff] (!%p1641_p11)   ;;  %v1898_v51 = vld [vmem:[%s2546_s30 + $0x60] ss:$16 sps:$4 sm:$0xff] (!%p1641_p11)   ;;  %v2619_v20 = vsub.s32 (!%p1641_p11), %v505_v13, %v2558_v15  ;;  %v1999_v13 = vld [vmem:[%s2546_s30 + $0x288] ss:$16 sps:$4 sm:$0xff] (!%p1641_p11)  }
  0xb0   : > { %v1899_v52 = vld [vmem:[%s2546_s30 + $0x260] ss:$16 sps:$4 sm:$0xff] (!%p1641_p11)   ;;  %v1900_v53 = vld [vmem:[%s2546_s30 + $0x84] ss:$16 sps:$4 sm:$0xff] (!%p1641_p11)  }
  0xb1   : > { %1279 = vmatpush1.bf16.msra.mxu0 (!%p1641_p11), %v1886_v43  ;;  %v1902_v54 = vld [vmem:[%s2546_s30 + $0x284] ss:$16 sps:$4 sm:$0xff] (!%p1641_p11)   ;;  %v1904_v55 = vld [vmem:[%s2546_s30 + $0x80] ss:$16 sps:$4 sm:$0xff] (!%p1641_p11)  }
  0xb2   : > { %1320 = vmatpush1.bf16.msra.mxu1 (!%p1641_p11), %v1887_v44  ;;  %1280 = vmatprep.subr.bf16.mxu0 (!%p1641_p11), %v1888_v45  ;;  %v1905_v56 = vld [vmem:[%s2546_s30 + $0x280] ss:$16 sps:$4 sm:$0xff] (!%p1641_p11)   ;;  %v1906_v57 = vld [vmem:[%s2546_s30 + $0xa4] ss:$16 sps:$4 sm:$0xff] (!%p1641_p11)  }
  0xb3   : > { %1321 = vmatprep.subr.bf16.mxu1 (!%p1641_p11), %v1890_v46  ;;  %v1908_v58 = vld [vmem:[%s2546_s30 + $0x2a4] ss:$16 sps:$4 sm:$0xff] (!%p1641_p11)   ;;  %v1910_v59 = vld [vmem:[%s2546_s30 + $0xa0] ss:$16 sps:$4 sm:$0xff] (!%p1641_p11)  }
  0xb4   : > { %v1911_v60 = vld [vmem:[%s2546_s30 + $0x2a0] ss:$16 sps:$4 sm:$0xff] (!%p1641_p11)   ;;  %v1912_v61 = vld [vmem:[%s2546_s30 + $0xc4] ss:$16 sps:$4 sm:$0xff] (!%p1641_p11)  }
  0xb5   : > { %1281 = vmatpush1.bf16.msra.mxu0 (!%p1641_p11), %v1892_v47  ;;  %v1914_v62 = vld [vmem:[%s2546_s30 + $0x2c4] ss:$16 sps:$4 sm:$0xff] (!%p1641_p11)   ;;  %v1916_v63 = vld [vmem:[%s2546_s30 + $0xc0] ss:$16 sps:$4 sm:$0xff] (!%p1641_p11)  }
  0xb6   : > { %1322 = vmatpush1.bf16.msra.mxu1 (!%p1641_p11), %v1893_v48  ;;  %1282 = vmatprep.subr.bf16.mxu0 (!%p1641_p11), %v1894_v49  ;;  %v1917_v0 = vld [vmem:[%s2546_s30 + $0x2c0] ss:$16 sps:$4 sm:$0xff] (!%p1641_p11)   ;;  %v1918_v1 = vld [vmem:[%s2546_s30 + $0xe4] ss:$16 sps:$4 sm:$0xff] (!%p1641_p11)  }
  0xb7   : > { %1323 = vmatprep.subr.bf16.mxu1 (!%p1641_p11), %v1896_v50  ;;  %v1920_v2 = vld [vmem:[%s2546_s30 + $0x2e4] ss:$16 sps:$4 sm:$0xff] (!%p1641_p11)   ;;  %v1922_v3 = vld [vmem:[%s2546_s30 + $0xe0] ss:$16 sps:$4 sm:$0xff] (!%p1641_p11)  }
  0xb8   : > { %v1923_v4 = vld [vmem:[%s2546_s30 + $0x2e0] ss:$16 sps:$4 sm:$0xff] (!%p1641_p11)   ;;  %v1924_v5 = vld [vmem:[%s2546_s30 + $0x104] ss:$16 sps:$4 sm:$0xff] (!%p1641_p11)  }
  0xb9   : > { %1283 = vmatpush1.bf16.msra.mxu0 (!%p1641_p11), %v1898_v51  ;;  %v1926_v6 = vld [vmem:[%s2546_s30 + $0x304] ss:$16 sps:$4 sm:$0xff] (!%p1641_p11)   ;;  %v1928_v9 = vld [vmem:[%s2546_s30 + $0x100] ss:$16 sps:$4 sm:$0xff] (!%p1641_p11)  }
  0xba   : > { %1324 = vmatpush1.bf16.msra.mxu1 (!%p1641_p11), %v1899_v52  ;;  %1284 = vmatprep.subr.bf16.mxu0 (!%p1641_p11), %v1900_v53  ;;  %v1929_v10 = vld [vmem:[%s2546_s30 + $0x300] ss:$16 sps:$4 sm:$0xff] (!%p1641_p11)   ;;  %v1930_v11 = vld [vmem:[%s2546_s30 + $0x124] ss:$16 sps:$4 sm:$0xff] (!%p1641_p11)   ;;  %v1970_v53 = vld [vmem:[%s2546_s30 + $0xc] ss:$16 sps:$4 sm:$0xff] (!%p1641_p11)  }
  0xbb   : > { %1325 = vmatprep.subr.bf16.mxu1 (!%p1641_p11), %v1902_v54  ;;  %v1932_v12 = vld [vmem:[%s2546_s30 + $0x324] ss:$16 sps:$4 sm:$0xff] (!%p1641_p11)   ;;  %v1934_v14 = vld [vmem:[%s2546_s30 + $0x120] ss:$16 sps:$4 sm:$0xff] (!%p1641_p11)  }
  0xbc   : > { %v1935_v16 = vld [vmem:[%s2546_s30 + $0x320] ss:$16 sps:$4 sm:$0xff] (!%p1641_p11)   ;;  %v1936_v17 = vld [vmem:[%s2546_s30 + $0x144] ss:$16 sps:$4 sm:$0xff] (!%p1641_p11)  }
  0xbd   : > { %1285 = vmatpush1.bf16.msra.mxu0 (!%p1641_p11), %v1904_v55  ;;  %v1938_v18 = vld [vmem:[%s2546_s30 + $0x344] ss:$16 sps:$4 sm:$0xff] (!%p1641_p11)   ;;  %v1940_v19 = vld [vmem:[%s2546_s30 + $0x140] ss:$16 sps:$4 sm:$0xff] (!%p1641_p11)   ;;  %v1968_v55 = vld [vmem:[%s2546_s30 + $0x8] ss:$16 sps:$4 sm:$0xff] (!%p1641_p11)  }
  0xbe   : > { %1326 = vmatpush1.bf16.msra.mxu1 (!%p1641_p11), %v1905_v56  ;;  %1286 = vmatprep.subr.bf16.mxu0 (!%p1641_p11), %v1906_v57  ;;  %v1948_v37 = vld [vmem:[%s2546_s30 + $0x184] ss:$16 sps:$4 sm:$0xff] (!%p1641_p11)   ;;  %v1952_v40 = vld [vmem:[%s2546_s30 + $0x180] ss:$16 sps:$4 sm:$0xff] (!%p1641_p11)   ;;  %v1974_v57 = vld [vmem:[%s2546_s30 + $0x2c] ss:$16 sps:$4 sm:$0xff] (!%p1641_p11)  }
  0xbf   : > { %1327 = vmatprep.subr.bf16.mxu1 (!%p1641_p11), %v1908_v58  ;;  %v1950_v38 = vld [vmem:[%s2546_s30 + $0x384] ss:$16 sps:$4 sm:$0xff] (!%p1641_p11)   ;;  %v1953_v41 = vld [vmem:[%s2546_s30 + $0x380] ss:$16 sps:$4 sm:$0xff] (!%p1641_p11)   ;;  %v1977_v58 = vld [vmem:[%s2546_s30 + $0x20c] ss:$16 sps:$4 sm:$0xff] (!%p1641_p11)  }
  0xc0   : > { %v1954_v42 = vld [vmem:[%s2546_s30 + $0x1a4] ss:$16 sps:$4 sm:$0xff] (!%p1641_p11)   ;;  %v1958_v45 = vld [vmem:[%s2546_s30 + $0x1a0] ss:$16 sps:$4 sm:$0xff] (!%p1641_p11)  }
  0xc1   : > { %1287 = vmatpush1.bf16.msra.mxu0 (!%p1641_p11), %v1910_v59  ;;  %v1956_v43 = vld [vmem:[%s2546_s30 + $0x3a4] ss:$16 sps:$4 sm:$0xff] (!%p1641_p11)   ;;  %v1959_v46 = vld [vmem:[%s2546_s30 + $0x3a0] ss:$16 sps:$4 sm:$0xff] (!%p1641_p11)  }
  0xc2   : > { %1328 = vmatpush1.bf16.msra.mxu1 (!%p1641_p11), %v1911_v60  ;;  %1288 = vmatprep.subr.bf16.mxu0 (!%p1641_p11), %v1912_v61  ;;  %v647_v44 = vld [vmem:[%s2546_s30 + $0x3c0] sm:$0x77] (!%p1641_p11)  ;;  %v1972_v60 = vld [vmem:[%s2546_s30 + $0x28] ss:$16 sps:$4 sm:$0xff] (!%p1641_p11)  }
  0xc3   : > { %1329 = vmatprep.subr.bf16.mxu1 (!%p1641_p11), %v1914_v62  ;;  %v1960_v47 = vld [vmem:[%s2546_s30 + $0x1c4] ss:$16 sps:$4 sm:$0xff] (!%p1641_p11)   ;;  %v1763_v48 = vcombine.high (!%p1641_p11), %v647_v44, %v647_v44  ;;  %v1762_v49 = vcombine.low (!%p1641_p11), %v647_v44, %v647_v44  ;;  %v1963_v50 = vld [vmem:[%s2546_s30 + $0x1c0] ss:$16 sps:$4 sm:$0xff] (!%p1641_p11)   ;;  %v1975_v61 = vld [vmem:[%s2546_s30 + $0x208] ss:$16 sps:$4 sm:$0xff] (!%p1641_p11)  }
  0xc4   : > { %v1966_v52 = vld [vmem:[%s2546_s30 + $0x1e4] ss:$16 sps:$4 sm:$0xff] (!%p1641_p11)   ;;  %v1971_v56 = vld [vmem:[%s2546_s30 + $0x1e0] ss:$16 sps:$4 sm:$0xff] (!%p1641_p11)   ;;  %v1980_v62 = vld [vmem:[%s2546_s30 + $0x4c] ss:$16 sps:$4 sm:$0xff] (!%p1641_p11)  }
  0xc5   : > { %1289 = vmatpush1.bf16.msra.mxu0 (!%p1641_p11), %v1916_v63  ;;  %v1265_v51 = vsel (!%p1641_p11), %vm1263_vm4, %v1762_v49, 0  ;;  %v1983_v63 = vld [vmem:[%s2546_s30 + $0x22c] ss:$16 sps:$4 sm:$0xff] (!%p1641_p11)  }
  0xc6   : > { %1330 = vmatpush1.bf16.msra.mxu1 (!%p1641_p11), %v1917_v0  ;;  %1290 = vmatprep.subr.bf16.mxu0 (!%p1641_p11), %v1918_v1  ;;  %v1978_v0 = vld [vmem:[%s2546_s30 + $0x48] ss:$16 sps:$4 sm:$0xff] (!%p1641_p11)   ;;  %v2040_v44 = vld [vmem:[%s2546_s30 + $0x18c] ss:$16 sps:$4 sm:$0xff] (!%p1641_p11)  }
  0xc7   : > { %1331 = vmatprep.subr.bf16.mxu1 (!%p1641_p11), %v1920_v2  ;;  %v1981_v1 = vld [vmem:[%s2546_s30 + $0x228] ss:$16 sps:$4 sm:$0xff] (!%p1641_p11)   ;;  %v1986_v2 = vld [vmem:[%s2546_s30 + $0x6c] ss:$16 sps:$4 sm:$0xff] (!%p1641_p11)  }
  0xc8   : > { %v2049_v49 = vld [vmem:[%s2546_s30 + $0x38c] ss:$16 sps:$4 sm:$0xff] (!%p1641_p11)  }
  0xc9   : > { %1291 = vmatpush1.bf16.msra.mxu0 (!%p1641_p11), %v1922_v3  ;;  %v1989_v3 = vld [vmem:[%s2546_s30 + $0x24c] ss:$16 sps:$4 sm:$0xff] (!%p1641_p11)  }
  0xca   : > { %1332 = vmatpush1.bf16.msra.mxu1 (!%p1641_p11), %v1923_v4  ;;  %1292 = vmatprep.subr.bf16.mxu0 (!%p1641_p11), %v1924_v5  ;;  %v1984_v4 = vld [vmem:[%s2546_s30 + $0x68] ss:$16 sps:$4 sm:$0xff] (!%p1641_p11)  }
  0xcb   : > { %1333 = vmatprep.subr.bf16.mxu1 (!%p1641_p11), %v1926_v6  ;;  %v1987_v5 = vld [vmem:[%s2546_s30 + $0x248] ss:$16 sps:$4 sm:$0xff] (!%p1641_p11)   ;;  %v1992_v6 = vld [vmem:[%s2546_s30 + $0x8c] ss:$16 sps:$4 sm:$0xff] (!%p1641_p11)  }
  0xcd   : > { %1293 = vmatpush1.bf16.msra.mxu0 (!%p1641_p11), %v1928_v9  ;;  %v1993_v9 = vld [vmem:[%s2546_s30 + $0x268] ss:$16 sps:$4 sm:$0xff] (!%p1641_p11)  }
  0xce   : > { %1334 = vmatpush1.bf16.msra.mxu1 (!%p1641_p11), %v1929_v10  ;;  %1294 = vmatprep.subr.bf16.mxu0 (!%p1641_p11), %v1930_v11  ;;  %v1998_v10 = vld [vmem:[%s2546_s30 + $0xac] ss:$16 sps:$4 sm:$0xff] (!%p1641_p11)  }
  0xcf   : > { %1335 = vmatprep.subr.bf16.mxu1 (!%p1641_p11), %v1932_v12  ;;  %v2001_v11 = vld [vmem:[%s2546_s30 + $0x28c] ss:$16 sps:$4 sm:$0xff] (!%p1641_p11)   ;;  %v1996_v12 = vld [vmem:[%s2546_s30 + $0xa8] ss:$16 sps:$4 sm:$0xff] (!%p1641_p11)  }
  0xd1   : > { %1295 = vmatpush1.bf16.msra.mxu0 (!%p1641_p11), %v1934_v14  ;;  %v2004_v14 = vld [vmem:[%s2546_s30 + $0xcc] ss:$16 sps:$4 sm:$0xff] (!%p1641_p11)  }
  0xd2   : > { %1336 = vmatpush1.bf16.msra.mxu1 (!%p1641_p11), %v1935_v16  ;;  %1296 = vmatprep.subr.bf16.mxu0 (!%p1641_p11), %v1936_v17  ;;  %v2007_v16 = vld [vmem:[%s2546_s30 + $0x2ac] ss:$16 sps:$4 sm:$0xff] (!%p1641_p11)   ;;  %v2002_v17 = vld [vmem:[%s2546_s30 + $0xc8] ss:$16 sps:$4 sm:$0xff] (!%p1641_p11)  }
  0xd3   : > { %1337 = vmatprep.subr.bf16.mxu1 (!%p1641_p11), %v1938_v18  ;;  %v2005_v18 = vld [vmem:[%s2546_s30 + $0x2a8] ss:$16 sps:$4 sm:$0xff] (!%p1641_p11)  }
  0xd5   : > { %1297 = vmatpush1.bf16.msra.mxu0 (!%p1641_p11), %v1940_v19  ;;  %v2010_v19 = vld [vmem:[%s2546_s30 + $0xec] ss:$16 sps:$4 sm:$0xff] (!%p1641_p11)  }
 0x17d   : > { %499 = sbr.rel (%p1641_p11) target bundleno = 693 (0x2b5), region = 60 }
 0x17f   : > { %v423_v25 = vpop.f32.mrb[0].mxu0 }
 0x180   : > { %v464_v26 = vpop.f32.mrb[0].mxu1  ;;  %v2566_v27 = vadd.f32 %v475_v21, %v423_v25  ;;  %v425_v29 = vpop.f32.mrb[1].mxu0  ;;  %v500_v21 = vld [vmem:[%s2756_s1] sm:$0xff] (!%p1641_p11) }
 0x181   : > { %v2568_v28 = vadd.f32 %v483_v22, %v464_v26  ;;  %v466_v30 = vpop.f32.mrb[1].mxu1  ;;  %v2570_v31 = vadd.f32 %v479_v23, %v425_v29  ;;  %v427_v33 = vpop.f32.mrb[2].mxu0  ;;  %v1941_v22 = vld [vmem:[%s2546_s30 + $0x340] ss:$16 sps:$4 sm:$0xff] (!%p1641_p11)   ;;  %v502_v23 = vcombine.high (!%p1641_p11), %v500_v21, %v500_v21  ;;  %v1942_v25 = vld [vmem:[%s2546_s30 + $0x164] ss:$16 sps:$4 sm:$0xff] (!%p1641_p11)  }
 0x182   : > { %v2572_v32 = vadd.f32 %v487_v24, %v466_v30  ;;  %v468_v34 = vpop.f32.mrb[2].mxu1  ;;  %v428_v35 = vpop.f32.mrb[3].mxu0  ;;  %v509_v24 = vrot.slane (!%p1641_p11), %v500_v21, %v2619_v20  ;;  %v1944_v26 = vld [vmem:[%s2546_s30 + $0x364] ss:$16 sps:$4 sm:$0xff] (!%p1641_p11)   ;;  %1338 = vmatpush1.bf16.msra.mxu1 (!%p1641_p11), %v1941_v22  ;;  %v1946_v33 = vld [vmem:[%s2546_s30 + $0x160] ss:$16 sps:$4 sm:$0xff] (!%p1641_p11)   ;;  %1298 = vmatprep.subr.bf16.mxu0 (!%p1641_p11), %v1942_v25 }
 0x183   : > { %v469_v36 = vpop.f32.mrb[3].mxu1  ;;  %v516_v29 = vrot.slane (!%p1641_p11), %v502_v23, %v2619_v20  ;;  %v1947_v34 = vld [vmem:[%s2546_s30 + $0x360] ss:$16 sps:$4 sm:$0xff] (!%p1641_p11)   ;;  %1339 = vmatprep.subr.bf16.mxu1 (!%p1641_p11), %v1944_v26  ;;  %1299 = vmatpush1.bf16.msra.mxu0 (!%p1641_p11), %v1946_v33  ;;  %v2013_v21 = vld [vmem:[%s2546_s30 + $0x2cc] ss:$16 sps:$4 sm:$0xff] (!%p1641_p11)  }
 0x184   : > { %v517_v30 = vcombine.high %v509_v24, %v509_v24  ;;  %1300 = vmatprep.subr.bf16.mxu0 %v1948_v37  ;;  %v2654_v59 = vpack.c.bf16 %v509_v24, %v509_v24  ;;  %v2008_v22 = vld [vmem:[%s2546_s30 + $0xe8] ss:$16 sps:$4 sm:$0xff]   ;;  %v2016_v24 = vld [vmem:[%s2546_s30 + $0x10c] ss:$16 sps:$4 sm:$0xff]  }
 0x185   : > { %v518_v35 = vcombine.high %v516_v29, %v516_v29  ;;  %v2647_v54 = vpack.c.bf16 %v516_v29, %v516_v29  ;;  %v2011_v23 = vld [vmem:[%s2546_s30 + $0x2c8] ss:$16 sps:$4 sm:$0xff]   ;;  %v2019_v25 = vld [vmem:[%s2546_s30 + $0x2ec] ss:$16 sps:$4 sm:$0xff]  }
 0x186   : > { %v524_v36 = vpack.c.bf16 %v517_v30, %v517_v30  ;;  %1340 = vmatpush1.bf16.msra.mxu1 %v1947_v34  ;;  %v2014_v26 = vld [vmem:[%s2546_s30 + $0x108] ss:$16 sps:$4 sm:$0xff]   ;;  %v2022_v30 = vld [vmem:[%s2546_s30 + $0x12c] ss:$16 sps:$4 sm:$0xff]  }
 0x187   : > { %v526_v39 = vpack.c.bf16 %v518_v35, %v518_v35  ;;  %1341 = vmatprep.subr.bf16.mxu1 %v1950_v38  ;;  %1301 = vmatpush1.bf16.msra.mxu0 %v1952_v40  ;;  %v2017_v29 = vld [vmem:[%s2546_s30 + $0x2e8] ss:$16 sps:$4 sm:$0xff]   ;;  %v2025_v33 = vld [vmem:[%s2546_s30 + $0x30c] ss:$16 sps:$4 sm:$0xff]  }
 0x188   : > { %1308 = vmatprep.mubr.bf16.mxu0 %v524_v36  ;;  %1302 = vmatprep.subr.bf16.mxu0 %v1954_v42  ;;  %v2020_v34 = vld [vmem:[%s2546_s30 + $0x128] ss:$16 sps:$4 sm:$0xff]   ;;  %v2031_v37 = vld [vmem:[%s2546_s30 + $0x32c] ss:$16 sps:$4 sm:$0xff]  }
 0x189   : > { %1767 = vmatprep.mubr.msk.bf16.mxu1 %vm1259_vm3, %v526_v39  ;;  %v2023_v35 = vld [vmem:[%s2546_s30 + $0x308] ss:$16 sps:$4 sm:$0xff]   ;;  %v2034_v40 = vld [vmem:[%s2546_s30 + $0x16c] ss:$16 sps:$4 sm:$0xff]  }
 0x18a   : > { %1342 = vmatpush1.bf16.msra.mxu1 %v1953_v41  ;;  %v2026_v38 = vld [vmem:[%s2546_s30 + $0x148] ss:$16 sps:$4 sm:$0xff]   ;;  %v2037_v41 = vld [vmem:[%s2546_s30 + $0x34c] ss:$16 sps:$4 sm:$0xff]  }
 0x18b   : > { %1343 = vmatprep.subr.bf16.mxu1 %v1956_v43  ;;  %1303 = vmatpush1.bf16.msra.mxu0 %v1958_v45  ;;  %v2032_v42 = vld [vmem:[%s2546_s30 + $0x168] ss:$16 sps:$4 sm:$0xff]   ;;  %v2043_v45 = vld [vmem:[%s2546_s30 + $0x36c] ss:$16 sps:$4 sm:$0xff]  }
 0x18c   : > { %1304 = vmatprep.subr.bf16.mxu0 %v1960_v47  ;;  %v2035_v43 = vld [vmem:[%s2546_s30 + $0x348] ss:$16 sps:$4 sm:$0xff]  }
 0x18d   : > { %v2041_v47 = vld [vmem:[%s2546_s30 + $0x368] ss:$16 sps:$4 sm:$0xff]  }
 0x18e   : > { %1344 = vmatpush1.bf16.msra.mxu1 %v1959_v46  ;;  %v2038_v46 = vld [vmem:[%s2546_s30 + $0x188] ss:$16 sps:$4 sm:$0xff]  }
 0x18f   : > { %1766 = vmatprep.subr.msk.bf16.mxu1 %vm1263_vm4, %v1763_v48  ;;  %1305 = vmatpush1.bf16.msra.mxu0 %v1963_v50  ;;  %v2046_v48 = vld [vmem:[%s2546_s30 + $0x1ac] ss:$16 sps:$4 sm:$0xff]   ;;  %v2044_v50 = vld [vmem:[%s2546_s30 + $0x1a8] ss:$16 sps:$4 sm:$0xff]  }
 0x190   : > { %1306 = vmatprep.subr.bf16.mxu0 %v1966_v52  ;;  %v2052_v52 = vld [vmem:[%s2546_s30 + $0x1cc] ss:$16 sps:$4 sm:$0xff]  }
 0x192   : > { %1346 = vmatpush1.bf16.msra.mxu1 %v1265_v51  ;;  %v2047_v51 = vld [vmem:[%s2546_s30 + $0x388] ss:$16 sps:$4 sm:$0xff]  }
 0x193   : > { %1358 = vmatprep.subr.bf16.mxu1 %v1970_v53  ;;  %1307 = vmatpush1.bf16.msra.mxu0 %v1971_v56  ;;  %v2055_v53 = vld [vmem:[%s2546_s30 + $0x3ac] ss:$16 sps:$4 sm:$0xff]   ;;  %v2050_v56 = vld [vmem:[%s2546_s30 + $0x1c8] ss:$16 sps:$4 sm:$0xff]  }
 0x194   : > { %1399 = vmatprep.subr.bf16.mxu0 %v1977_v58  ;;  %v2058_v58 = vld [vmem:[%s2546_s30 + $0x1ec] ss:$16 sps:$4 sm:$0xff]  }
 0x195   : > { %1350 = vmatmul.mubr.bf16.vlgmr.msra.gmra.mrb[0].mxu1 %v2647_v54 }
 0x196   : > { %1359 = vmatpush1.bf16.msra.mxu1 %v1968_v55  ;;  %1390 = vmatprep.mubr.bf16.mxu1 %v524_v36  ;;  %v2028_v36 = vld [vmem:[%s2546_s30 + $0x14c] ss:$16 sps:$4 sm:$0xff]  }
 0x197   : > { %1360 = vmatprep.subr.bf16.mxu1 %v1974_v57  ;;  %1309 = vmatmul.mubr.bf16.vlgmr.msra.gmra.mrb[0].mxu0 %v2654_v59  ;;  %v648_v55 = vld [vmem:[%s2546_s30 + $0x3c8] sm:$0x77] }
 0x198   : > { %1400 = vmatpush1.bf16.msra.mxu0 %v1975_v61  ;;  %1769 = vmatprep.mubr.msk.bf16.mxu0 %vm1259_vm3, %v526_v39  ;;  %v2029_v39 = vld [vmem:[%s2546_s30 + $0x328] ss:$16 sps:$4 sm:$0xff]   ;;  %v1764_v61 = vcombine.low %v648_v55, %v648_v55 }
 0x199   : > { %1401 = vmatprep.subr.bf16.mxu0 %v1983_v63  ;;  %v2053_v57 = vld [vmem:[%s2546_s30 + $0x3a8] ss:$16 sps:$4 sm:$0xff]  }
 0x19a   : > { %1361 = vmatpush1.bf16.msra.mxu1 %v1972_v60  ;;  %v1765_v60 = vcombine.high %v648_v55, %v648_v55  ;;  %v1271_v63 = vsel %vm1263_vm4, %v1764_v61, 0 }
 0x19b   : > { %1362 = vmatprep.subr.bf16.mxu1 %v1980_v62  ;;  %v2056_v62 = vld [vmem:[%s2546_s30 + $0x1e8] ss:$16 sps:$4 sm:$0xff]  }
 0x19c   : > { %1402 = vmatpush1.bf16.msra.mxu0 %v1981_v1 }
 0x19d   : > { %1403 = vmatprep.subr.bf16.mxu0 %v1989_v3 }
 0x19e   : > { %1363 = vmatpush1.bf16.msra.mxu1 %v1978_v0 }
 0x19f   : > { %1364 = vmatprep.subr.bf16.mxu1 %v1986_v2 }
 0x1a0   : > { %1404 = vmatpush1.bf16.msra.mxu0 %v1987_v5 }
 0x1a1   : > { %1405 = vmatprep.subr.bf16.mxu0 %v1995_v7 }
 0x1a2   : > { %1365 = vmatpush1.bf16.msra.mxu1 %v1984_v4 }
 0x1a3   : > { %1366 = vmatprep.subr.bf16.mxu1 %v1992_v6 }
 0x1a4   : > { %1406 = vmatpush1.bf16.msra.mxu0 %v1993_v9 }
 0x1a5   : > { %1407 = vmatprep.subr.bf16.mxu0 %v2001_v11 }
 0x1a6   : > { %1367 = vmatpush1.bf16.msra.mxu1 %v1990_v8 }
 0x1a7   : > { %1368 = vmatprep.subr.bf16.mxu1 %v1998_v10 }
 0x1a8   : > { %1408 = vmatpush1.bf16.msra.mxu0 %v1999_v13 }
 0x1a9   : > { %1409 = vmatprep.subr.bf16.mxu0 %v2007_v16 }
 0x1aa   : > { %1369 = vmatpush1.bf16.msra.mxu1 %v1996_v12 }
 0x1ab   : > { %1370 = vmatprep.subr.bf16.mxu1 %v2004_v14 }
 0x1ac   : > { %1410 = vmatpush1.bf16.msra.mxu0 %v2005_v18 }
 0x1ad   : > { %1411 = vmatprep.subr.bf16.mxu0 %v2013_v21 }
 0x1ae   : > { %1371 = vmatpush1.bf16.msra.mxu1 %v2002_v17 }
 0x1af   : > { %1372 = vmatprep.subr.bf16.mxu1 %v2010_v19 }
 0x1b0   : > { %1412 = vmatpush1.bf16.msra.mxu0 %v2011_v23 }
 0x1b1   : > { %1413 = vmatprep.subr.bf16.mxu0 %v2019_v25 }
 0x1b2   : > { %1373 = vmatpush1.bf16.msra.mxu1 %v2008_v22 }
 0x1b3   : > { %1374 = vmatprep.subr.bf16.mxu1 %v2016_v24 }
 0x1b4   : > { %1414 = vmatpush1.bf16.msra.mxu0 %v2017_v29 }
 0x1b5   : > { %1415 = vmatprep.subr.bf16.mxu0 %v2025_v33 }
 0x1b6   : > { %1375 = vmatpush1.bf16.msra.mxu1 %v2014_v26 }
 0x1b7   : > { %1376 = vmatprep.subr.bf16.mxu1 %v2022_v30 }
 0x1b8   : > { %1416 = vmatpush1.bf16.msra.mxu0 %v2023_v35 }
 0x1b9   : > { %1417 = vmatprep.subr.bf16.mxu0 %v2031_v37 }
 0x1ba   : > { %1377 = vmatpush1.bf16.msra.mxu1 %v2020_v34 }
 0x1bb   : > { %1378 = vmatprep.subr.bf16.mxu1 %v2028_v36 }
 0x1bc   : > { %1418 = vmatpush1.bf16.msra.mxu0 %v2029_v39 }
 0x1bd   : > { %1419 = vmatprep.subr.bf16.mxu0 %v2037_v41 }
 0x1be   : > { %1379 = vmatpush1.bf16.msra.mxu1 %v2026_v38 }
 0x1bf   : > { %1380 = vmatprep.subr.bf16.mxu1 %v2034_v40 }
 0x1c0   : > { %1420 = vmatpush1.bf16.msra.mxu0 %v2035_v43 }
 0x1c1   : > { %1421 = vmatprep.subr.bf16.mxu0 %v2043_v45 }
 0x1c2   : > { %1381 = vmatpush1.bf16.msra.mxu1 %v2032_v42 }
 0x1c3   : > { %1382 = vmatprep.subr.bf16.mxu1 %v2040_v44 }
 0x1c4   : > { %1422 = vmatpush1.bf16.msra.mxu0 %v2041_v47 }
 0x1c5   : > { %1423 = vmatprep.subr.bf16.mxu0 %v2049_v49 }
 0x1c6   : > { %1383 = vmatpush1.bf16.msra.mxu1 %v2038_v46 }
 0x1c7   : > { %1384 = vmatprep.subr.bf16.mxu1 %v2046_v48 }
 0x1c8   : > { %1424 = vmatpush1.bf16.msra.mxu0 %v2047_v51 }
 0x1c9   : > { %1425 = vmatprep.subr.bf16.mxu0 %v2055_v53 }
 0x1ca   : > { %1385 = vmatpush1.bf16.msra.mxu1 %v2044_v50 }
 0x1cb   : > { %1386 = vmatprep.subr.bf16.mxu1 %v2052_v52 }
 0x1cc   : > { %1426 = vmatpush1.bf16.msra.mxu0 %v2053_v57 }
 0x1cd   : > { %1768 = vmatprep.subr.msk.bf16.mxu0 %vm1263_vm4, %v1765_v60 }
 0x1ce   : > { %1387 = vmatpush1.bf16.msra.mxu1 %v2050_v56 }
 0x1cf   : > { %1388 = vmatprep.subr.bf16.mxu1 %v2058_v58 }
 0x1d0   : > { %1428 = vmatpush1.bf16.msra.mxu0 %v1271_v63 }
 0x1d2   : > { %1389 = vmatpush1.bf16.msra.mxu1 %v2056_v62 }
 0x1d3   : > { %1432 = vmatmul.mubr.bf16.vlgmr.msra.gmra.mrb[4].mxu0 %v2647_v54 }
 0x1d5   : > { %1391 = vmatmul.mubr.bf16.vlgmr.msra.gmra.mrb[4].mxu1 %v2654_v59 }
 0x268   : > { %v1351_v0 = vpop.f32.mrb[0].mxu1 }
 0x269   : > { %v1353_v1 = vpop.f32.mrb[1].mxu1 }
 0x26a   : > { %v1355_v2 = vpop.f32.mrb[2].mxu1  ;;  %v1310_v4 = vpop.f32.mrb[0].mxu0 }
 0x26b   : > { %v1356_v3 = vpop.f32.mrb[3].mxu1  ;;  %v1352_v5 = vadd.f32 %v1351_v0, %v1310_v4  ;;  %v1312_v6 = vpop.f32.mrb[1].mxu0 }
 0x26c   : > { %v1354_v7 = vadd.f32 %v1353_v1, %v1312_v6  ;;  %v1314_v8 = vpop.f32.mrb[2].mxu0 }
 0x26d   : > { %v1440_v9 = vadd.f32 %v1352_v5, %v2566_v27  ;;  %v1315_v10 = vpop.f32.mrb[3].mxu0 }
 0x26e   : > { %v1441_v11 = vadd.f32 %v1354_v7, %v2570_v31 }
 0x270   : > { %v1448_v12 = vcombine.low %v1440_v9, %v1441_v11 }
 0x272   : > { %v1456_v26 = vrot.slane %v1448_v12, %v2619_v20 }
 0x2a6   : > { %v1433_v59 = vpop.f32.mrb[4].mxu0 }
 0x2a7   : > { %v1435_v16 = vpop.f32.mrb[5].mxu0 }
 0x2a8   : > { %v1392_v13 = vpop.f32.mrb[4].mxu1  ;;  %v1437_v19 = vpop.f32.mrb[6].mxu0 }
 0x2a9   : > { %v1434_v14 = vadd.f32 %v1433_v59, %v1392_v13  ;;  %v1394_v54 = vpop.f32.mrb[5].mxu1  ;;  %v1438_v23 = vpop.f32.mrb[7].mxu0 }
 0x2aa   : > { %v1436_v17 = vadd.f32 %v1435_v16, %v1394_v54  ;;  %v1396_v18 = vpop.f32.mrb[6].mxu1 }
 0x2ab   : > { %v1442_v21 = vadd.f32 %v1434_v14, %v2568_v28  ;;  %v1397_v22 = vpop.f32.mrb[7].mxu1 }
 0x2ac   : > { %v1443_v24 = vadd.f32 %v1436_v17, %v2572_v32 }
 0x2ae   : > { %v1449_v25 = vcombine.low %v1442_v21, %v1443_v24 }
 0x2b0   : > { %v1463_v29 = vrot.slane %v1449_v25, %v2619_v20 }
 0x2b2   : > { %v1464_v30 = vcombine.low %v1456_v26, %v1463_v29 }
 0x2b4   : > { %1466 = vst [vmem:[%s2556_s17] sm:$0xff] %v1464_v30 }
 0x2b5 PF: > { %p1770_p3 = scmp.lt.s32.totalorder %s2401_s7, 3 }
 0x2b6   : > { %v2258_v33 = vmov (!%p1770_p3), 1983009808   ;;  %v1475_v35 = vcombine.low (!%p1770_p3), %v2566_v27, %v2570_v31  ;;  %v1476_v36 = vcombine.low (!%p1770_p3), %v2568_v28, %v2572_v32 }
 0x2b7   : > { %1470 = sbr.rel (%p1770_p3) target bundleno = 706 (0x2c2), region = 64  ;;  %v1478_v34 = vunpack.c.l.s4 (!%p1770_p3), %v2258_v33 }
 0x2b9   : > { %v1479_v37 = vunpack.c.0.s8 (!%p1770_p3), %v1478_v34 }
 0x2bb   : > { %v1482_v38 = vsub.s32 (!%p1770_p3), %v1479_v37, %v2558_v15 }
 0x2bd   : > { %v1483_v39 = vrot.slane (!%p1770_p3), %v1475_v35, %v1482_v38  ;;  %v1490_v20 = vrot.slane (!%p1770_p3), %v1476_v36, %v1482_v38 }
 0x2bf   : > { %v1491_v40 = vcombine.low %v1483_v39, %v1490_v20 }
 0x2c1   : > { %1493 = vst [vmem:[%s2556_s17] sm:$0xff] %v1491_v40 }
 0x2c2 PF: > { %s2793_s7 = sld [smem:[#allocation12_spill]]  ;;  %p19_p10 = scmp.ge.s32.totalorder %s2325_s25, 6  }
 0x2c3   : > { %s2794_s18 = smov %s2225_s19  ;;  %s2795_s19 = smov %s2229_s20 }
 0x2c4   : > { %s2796_s20 = smov %s2496_s26  ;;  %s2797_s21 = smov %s2237_s22 }
 0x2c5   : > { %s2798_s22 = smov %s2241_s23  ;;  %s2800_s24 = smov %s2325_s25 }
 0x2c6   :  { %21 = sbr.rel (!%p19_p10) target bundleno = 11 (0xb), region = 117 }
 0x2c8   : > { %s2799_s23 = smov %s2793_s7 }
 0x2cd   :  { %1516 = vsyncpa [#allocation3], 1 }
 0x2ce   :  { %1518 = vsyncpa [#allocation3 + $0x1], 1 }
 0x2cf   :  { %1519 = vsyncpa [#allocation5], 1 }
 0x2d0   :  { %1521 = vsyncpa [#allocation5 + $0x1], 1 }
 0x2d1   :  { %1522 = vsyncpa [#allocation8], 1 }
 0x2d2   :  { %1524 = vsyncpa [#allocation8 + $0x1], 1 }

// kernel: _lambda_.4
= control target key start
LH: loop header
LB: loop body
LE: loop exit
PB: predicated region body
PF: predicated region fallthrough
CT: control target
= control target key end

     0   :  { %s655_s12 = smov 0   ;;  %s657_s13 = smov 0   ;;  %s732_s0 = inlined_call_operand.vmem [shape: f32[32,55], index: 0, kind: input, shape index: {}]   ;;  %s733_s1 = inlined_call_operand.vmem [shape: f32[6,512], index: 1, kind: input, shape index: {}]   ;;  %s734_s2 = inlined_call_operand.vmem [shape: bf16[55,512], index: 2, kind: input, shape index: {}]   ;;  %s735_s3 = inlined_call_operand.vmem [shape: f32[6,512], index: 3, kind: output, shape index: {}]  }
   0x1   :  { %s659_s14 = smov 0  }
   0x2 LB: > { %s538_s15 = sadd.s32 4294967295, %s631_s14   ;;  %s672_s16 = sadd.s32 1, %s631_s14   ;;  %s631_s14 = sphi %s659_s14, %s738_s14   ;;  %s627_s13 = sphi %s657_s13, %s737_s13   ;;  %s623_s12 = sphi %s655_s12, %s736_s12  }
   0x3   : > { %s64_s17 = ssub.s32 %s631_s14, %s672_s16  ;;  %s67_s18 = sadd.s32 1, %s627_s13 }
   0x4   : > { %p65_p0 = scmp.eq.s32.totalorder %s64_s17, 0  ;;  %p74_p1 = scmp.ne.s32.totalorder %s627_s13, %s623_s12 }
   0x5   : > { %p75_p2 = scmp.eq.s32.totalorder %s631_s14, 0  ;;  %p541_p4 = scmp.ge.s32.totalorder %s631_s14, 2 }
   0x6   : > { %s681_s19 = scalar_select %p65_p0, %s627_s13, %s67_s18  }
   0x7   : > { %p76_p3 = por %p75_p2, %p74_p1  ;;  %129 = sbr.rel (%p541_p4) target bundleno = 22 (0x16), region = 20 }
   0xe   : > { %141 = sbr.rel (!%p76_p3) target bundleno = 22 (0x16), region = 28  ;;  %s143_s20 = sand.u32 (%p76_p3), 1, %s627_s13  }
   0xf   : > { %s561_s21 = sshll.u32 (%p76_p3), %s631_s14, 3  ;;  %s570_s22 = smul.u32 (%p76_p3), 56, %s143_s20 }
  0x10   : > { %s148_s25 = scalar_lea.vmem (%p76_p3), %s734_s2, %s561_s21 }
  0x11   : > { %v188_v0 = vld [vmem:[%s148_s25] sm:$0xff] (%p76_p3)  ;;  %v190_v1 = vld [vmem:[%s148_s25 + $0x10] sm:$0xff] (%p76_p3)  ;;  %s145_s26 = scalar_lea.vmem (%p76_p3), [#allocation2], %s570_s22 }
  0x12   : > { %v192_v2 = vld [vmem:[%s148_s25 + $0x20] sm:$0xff] (%p76_p3)  ;;  %v194_v3 = vld [vmem:[%s148_s25 + $0x30] sm:$0xff] (%p76_p3)  ;;  %189 = vst [vmem:[%s145_s26] sm:$0xff] (%p76_p3), %v188_v0  ;;  %191 = vst [vmem:[%s145_s26 + $0x8] sm:$0xff] (%p76_p3), %v190_v1 }
  0x13   : > { %v196_v4 = vld [vmem:[%s148_s25 + $0x40] sm:$0xff] (%p76_p3)  ;;  %v198_v5 = vld [vmem:[%s148_s25 + $0x50] sm:$0xff] (%p76_p3)  ;;  %193 = vst [vmem:[%s145_s26 + $0x10] sm:$0xff] (%p76_p3), %v192_v2  ;;  %195 = vst [vmem:[%s145_s26 + $0x18] sm:$0xff] (%p76_p3), %v194_v3 }
  0x14   : > { %197 = vst [vmem:[%s145_s26 + $0x20] sm:$0xff] (%p76_p3), %v196_v4  ;;  %199 = vst [vmem:[%s145_s26 + $0x28] sm:$0xff] (%p76_p3), %v198_v5  ;;  %v200_v6 = vld [vmem:[%s148_s25 + $0x60] sm:$0xff] (%p76_p3) }
  0x15   : > { %201 = vst [vmem:[%s145_s26 + $0x30] sm:$0xff] %v200_v6 }
  0x16 PF: > { %p544_p5 = scmp.ge.s32.totalorder %s631_s14, 1  ;;  %p206_p6 = scmp.lt.s32.totalorder %s631_s14, 3 }
  0x18   : > { %p207_p7 = pnand %p544_p5, %p206_p6 }
  0x19   : > { %s213_s27 = sand.u32 (!%p207_p7), 1, %s623_s12   ;;  %v633_v7 = vmov (!%p207_p7), 0   ;;  %vm310_vm0 = vcmask (!%p207_p7), 1042432   ;;  %vm311_vm1 = vcmask (!%p207_p7), 1043456   ;;  %v634_v11 = vmov (!%p207_p7), 65535   ;;  %v255_v21 = vld [vmem:[%s732_s0] sm:$0xff] (!%p207_p7) }
  0x1a   : > { %210 = sbr.rel (%p207_p7) target bundleno = 277 (0x115), region = 66  ;;  %352 = vmatprep.mubr.bf16.mxu0 (!%p207_p7), %v633_v7  ;;  %362 = vmatprep.mubr.bf16.mxu1 (!%p207_p7), %v633_v7  ;;  %v312_v12 = vsel (!%p207_p7), %vm310_vm0, 4294967295, %v634_v11  ;;  %v256_v23 = vld [vmem:[%s732_s0 + $0x8] sm:$0xff] (!%p207_p7)  ;;  %v257_v24 = vld [vmem:[%s732_s0 + $0x10] sm:$0xff] (!%p207_p7)  ;;  %v258_v25 = vld [vmem:[%s732_s0 + $0x18] sm:$0xff] (!%p207_p7)  ;;  %vm303_vm2 = vcmask (!%p207_p7), 449536  }
  0x1b   : > { %s571_s28 = smul.u32 (!%p207_p7), 56, %s213_s27  ;;  %v313_v17 = vsel (!%p207_p7), %vm311_vm1, %v312_v12, 0  ;;  %v259_v26 = vpack.c.bf16 (!%p207_p7), %v256_v23, %v255_v21  ;;  %v260_v27 = vpack.c.bf16 (!%p207_p7), %v258_v25, %v257_v24  ;;  %s545_s11 = sshll.u32 (!%p207_p7), %s538_s15, 1  ;;  %vm457_vm3 = vcmask (!%p207_p7), 1041408  }
  0x1c   : > { %p242_p8 = scmp.lt.s32.totalorder (!%p207_p7), %s545_s11, 3 }
  0x1d   : > { %s215_s29 = scalar_lea.vmem (!%p207_p7), [#allocation2], %s571_s28 }
  0x1e   : > { %v598_v8 = vld [vmem:[%s215_s29 + $0x4] ss:$8 sps:$4 sm:$0xff] (!%p207_p7)   ;;  %v600_v9 = vld [vmem:[%s215_s29] ss:$8 sps:$4 sm:$0xff] (!%p207_p7)   ;;  %v601_v10 = vld [vmem:[%s215_s29 + $0x14] ss:$8 sps:$4 sm:$0xff] (!%p207_p7)  }
  0x1f   : > { %320 = vmatprep.subr.bf16.mxu0 (!%p207_p7), %v598_v8  ;;  %562 = vmatprep.subr.bf16.mxu1 (!%p207_p7), %v598_v8  ;;  %v603_v13 = vld [vmem:[%s215_s29 + $0x10] ss:$8 sps:$4 sm:$0xff] (!%p207_p7)   ;;  %v604_v14 = vld [vmem:[%s215_s29 + $0x24] ss:$8 sps:$4 sm:$0xff] (!%p207_p7)   ;;  %v606_v18 = vld [vmem:[%s215_s29 + $0x20] ss:$8 sps:$4 sm:$0xff] (!%p207_p7)  }
  0x20   : > { %321 = vmatpush1.bf16.msra.mxu0 (!%p207_p7), %v600_v9  ;;  %566 = vmatpush1.bf16.msra.mxu1 (!%p207_p7), %v600_v9  ;;  %v267_v15 = vld [vmem:[%s215_s29 + $0x30] sm:$0xff] (!%p207_p7) }
  0x21   : > { %322 = vmatprep.subr.bf16.mxu0 %v601_v10  ;;  %563 = vmatprep.subr.bf16.mxu1 %v601_v10  ;;  %v556_v16 = vcombine.high %v267_v15, %v267_v15  ;;  %v555_v19 = vcombine.low %v267_v15, %v267_v15  ;;  %s740_s11 = smov (!%p242_p8, %s545_s11), 3 }
  0x22   : > { %s546_s12 = sshll.u32 %s740_s11, 3 }
  0x23   : > { %v318_v20 = vand.u32 %v556_v16, %v313_v17  ;;  %v315_v22 = vand.u32 %v555_v19, %v313_v17  ;;  %s245_s20 = scalar_lea.vmem %s733_s1, %s546_s12  ;;  %s252_s21 = scalar_lea.vmem %s735_s3, %s546_s12 }
  0x24   : > { %323 = vmatpush1.bf16.msra.mxu0 %v603_v13  ;;  %567 = vmatpush1.bf16.msra.mxu1 %v603_v13  ;;  %v371_v28 = vld [vmem:[%s245_s20] sm:$0x3f]  ;;  %v372_v29 = vld [vmem:[%s245_s20 + $0x8] sm:$0x3f] }
  0x25   : > { %324 = vmatprep.subr.bf16.mxu0 %v604_v14  ;;  %564 = vmatprep.subr.bf16.mxu1 %v604_v14 }
  0x28   : > { %325 = vmatpush1.bf16.msra.mxu0 %v606_v18  ;;  %568 = vmatpush1.bf16.msra.mxu1 %v606_v18 }
  0x29   : > { %326 = vmatprep.subr.bf16.mxu0 %v318_v20  ;;  %565 = vmatprep.subr.bf16.mxu1 %v318_v20 }
  0x2c   : > { %327 = vmatpush1.bf16.msra.mxu0 %v315_v22  ;;  %569 = vmatpush1.bf16.msra.mxu1 %v315_v22 }
  0x2f   : > { %557 = vmatmul.mubr.msk.bf16.vlgmr.msra.gmra.mrb[0].mxu0 %vm303_vm2, %v259_v26  ;;  %558 = vmatmul.mubr.msk.bf16.vlgmr.msra.gmra.mrb[0].mxu1 %vm303_vm2, %v260_v27 }
 0x102   : > { %v354_v30 = vpop.f32.mrb[0].mxu0  ;;  %v364_v31 = vpop.f32.mrb[0].mxu1 }
 0x103   : > { %v373_v32 = vmul.f32 %v371_v28, %v354_v30  ;;  %v421_v33 = vmul.f32 %v371_v28, %v364_v31  ;;  %v356_v34 = vpop.f32.mrb[1].mxu0  ;;  %v366_v35 = vpop.f32.mrb[1].mxu1  ;;  %v439_v61 = vrot.slane %v364_v31, 6  ;;  %v391_v9 = vrot.slane %v354_v30, 6 }
 0x104   : > { %v374_v36 = vmul.f32 %v372_v29, %v356_v34  ;;  %v422_v37 = vmul.f32 %v372_v29, %v366_v35  ;;  %v358_v38 = vpop.f32.mrb[2].mxu0  ;;  %v368_v39 = vpop.f32.mrb[2].mxu1  ;;  %v440_v2 = vrot.slane %v366_v35, 6  ;;  %v392_v12 = vrot.slane %v356_v34, 6 }
 0x105   : > { %v377_v40 = vrot.slane %v373_v32, 2  ;;  %v425_v41 = vrot.slane %v421_v33, 2  ;;  %v360_v42 = vpop.f32.mrb[3].mxu0  ;;  %v369_v43 = vpop.f32.mrb[3].mxu1  ;;  %v431_v44 = vrot.slane %v421_v33, 4  ;;  %v397_v49 = vmul.f32 %v371_v28, %v358_v38 }
 0x106   : > { %v378_v45 = vrot.slane %v374_v36, 2  ;;  %v426_v46 = vrot.slane %v422_v37, 2  ;;  %v432_v48 = vrot.slane %v422_v37, 4  ;;  %v398_v51 = vmul.f32 %v372_v29, %v360_v42 }
 0x107   : > { %v429_v47 = vadd.f32 %v425_v41, %v421_v33  ;;  %v381_v52 = vadd.f32 %v377_v40, %v373_v32  ;;  %v401_v53 = vrot.slane %v397_v49, 2  ;;  %v383_v57 = vrot.slane %v373_v32, 4 }
 0x108   : > { %v430_v50 = vadd.f32 %v426_v46, %v422_v37  ;;  %v382_v55 = vadd.f32 %v378_v45, %v374_v36  ;;  %v402_v56 = vrot.slane %v398_v51, 2  ;;  %v407_v60 = vrot.slane %v397_v49, 4 }
 0x109   : > { %v435_v54 = vadd.f32 %v431_v44, %v429_v47  ;;  %v405_v59 = vadd.f32 %v401_v53, %v397_v49  ;;  %v384_v62 = vrot.slane %v374_v36, 4  ;;  %v408_v0 = vrot.slane %v398_v51, 4 }
 0x10a   : > { %v436_v58 = vadd.f32 %v432_v48, %v430_v50  ;;  %v406_v63 = vadd.f32 %v402_v56, %v398_v51  ;;  %v387_v1 = vadd.f32 %v383_v57, %v381_v52  ;;  %v415_v4 = vrot.slane %v358_v38, 6 }
 0x10b   : > { %v411_v3 = vadd.f32 %v407_v60, %v405_v59  ;;  %v443_v5 = vadd.f32 %v439_v61, %v435_v54  ;;  %v388_v6 = vadd.f32 %v384_v62, %v382_v55  ;;  %v416_v8 = vrot.slane %v360_v42, 6 }
 0x10c   : > { %v412_v7 = vadd.f32 %v408_v0, %v406_v63  ;;  %v444_v10 = vadd.f32 %v440_v2, %v436_v58  ;;  %v395_v14 = vadd.f32 %v391_v9, %v387_v1 }
 0x10d   : > { %v419_v11 = vadd.f32 %v415_v4, %v411_v3  ;;  %v453_v16 = vrot.slane %v443_v5, 4  ;;  %v396_v17 = vadd.f32 %v392_v12, %v388_v6 }
 0x10e   : > { %v420_v13 = vadd.f32 %v416_v8, %v412_v7  ;;  %v454_v19 = vrot.slane %v444_v10, 4 }
 0x10f   : > { %v447_v15 = vrot.slane %v419_v11, 6 }
 0x110   : > { %v448_v18 = vrot.slane %v420_v13, 6 }
 0x111   : > { %v458_v20 = vsel %vm457_vm3, %v395_v14, %v447_v15 }
 0x112   : > { %v460_v21 = vsel %vm311_vm1, %v458_v20, %v453_v16  ;;  %v459_v22 = vsel %vm457_vm3, %v396_v17, %v448_v18 }
 0x113   : > { %462 = vst [vmem:[%s252_s21] sm:$0x3f] %v460_v21  ;;  %v461_v23 = vsel %vm311_vm1, %v459_v22, %v454_v19 }
 0x114   : > { %463 = vst [vmem:[%s252_s21 + $0x8] sm:$0x3f] %v461_v23 }
 0x115 PF: > { %p10_p9 = scmp.ge.s32.totalorder %s672_s16, 4   ;;  %s736_s12 = smov %s627_s13 }
 0x116   : > { %s737_s13 = smov %s681_s19  ;;  %s738_s14 = smov %s672_s16 }
 0x117   :  { %12 = sbr.rel (!%p10_p9) target bundleno = 2 (0x2), region = 108 }

// kernel: _lambda_.5
= control target key start
LH: loop header
LB: loop body
LE: loop exit
PB: predicated region body
PF: predicated region fallthrough
CT: control target
= control target key end

     0   :  { %s289_s0 = inlined_call_operand.vmem [shape: f32[2,8], index: 0, kind: input, shape index: {}]   ;;  %s290_s1 = inlined_call_operand.vmem [shape: f32[2,9], index: 1, kind: input, shape index: {}]   ;;  %s291_s2 = inlined_call_operand.vmem [shape: f32[3,2,128], index: 2, kind: input, shape index: {}]   ;;  %s292_s3 = inlined_call_operand.hbm [shape: f32[2,3], index: 3, kind: output, shape index: {0}]   ;;  %s293_s4 = inlined_call_operand.vmem [shape: f32[2,2,128], index: 4, kind: output, shape index: {1}]  }
   0x1   :  { %v17_v0 = vld [vmem:[%s289_s0] sm:$0x3] }
   0x2   :  { %10 = vsyncpa [#allocation3], 0  ;;  %v19_v1 = vmul.f32 200.0, %v17_v0  ;;  %v43_v2 = vmul.f32 0.5, %v17_v0  ;;  %s213_s17 = smov 125   ;;  %s214_s18 = smov 126  }
   0x3   :  { %s215_s19 = smov 3   ;;  %v216_v6 = vmov 0   ;;  %s217_s0 = smov 5   ;;  %v219_v11 = vmov 1   ;;  %v18_v20 = vld [vmem:[%s290_s1] sm:$0x3] }
   0x4   :  { %36 = vrot.lane.b32.xlu0 %v19_v1, %s213_s17  ;;  %45 = vrot.lane.b32.xlu1 %v43_v2, %s214_s18  ;;  %v21_v5 = vmul.f32 0.004464286, %v19_v1  ;;  %s218_s20 = smov 4   ;;  %v22_v21 = vmul.f32 2.0, %v18_v20  ;;  %v220_v24 = vmov 3   ;;  %v221_v25 = vmov 5  }
   0x5   :  { %176 = vset.pattern.permute.xlu0 %v216_v6  ;;  %177 = vset.pattern.permute.xlu1 %v219_v11  ;;  %s222_s23 = smov 2   ;;  %v223_v30 = vmov 2   ;;  %v224_v31 = vmov 4   ;;  %s225_s1 = smov 127   ;;  %v89_v32 = vld [vmem:[%s291_s2 + $0x4] sm:$0x3] }
   0x6   :  { %v23_v7 = vmul.f32 224.0, %v21_v5  ;;  %v87_v36 = vld [vmem:[%s291_s2] sm:$0x3]  ;;  %v88_v40 = vld [vmem:[%s291_s2 + $0x2] sm:$0x3]  ;;  %vm81_vm0 = vcmask 7168  }
   0x7   :  { %s226_s7 = smov [#allocation2]   ;;  %vm83_vm1 = vcmask 15360   ;;  %vm85_vm2 = vcmask 17408  }
   0x8   :  { %25 = vrot.lane.b32.xlu0 %v17_v0, %s215_s19  ;;  %s150_s8 = sshll.u32 %s226_s7, 4  ;;  %s151_s8 = int_to_ptr.vmem [resolvable:$true] %s150_s8 }
   0x9   :  { %s189_s9 = scalar_lea.vmem %s151_s8, 32  ;;  %p194_p1 = scmp.lt.s32.totalorder %s151_s8, %s151_s8 }
   0xa   :  { %p190_p0 = scmp.ne.s32.totalorder %s151_s8, %s189_s9  ;;  %p195_p2 = scmp.lt.s32.totalorder %s189_s9, %s189_s9 }
   0xc   :  { %p196_p3 = por %p195_p2, %p194_p1 }
   0xe   :  { %p197_p4 = pnand %p196_p3, %p190_p0 }
  0x76   :  { %v37_v3 = vpop.permute.xlu0 %36  ;;  %v46_v12 = vpop.permute.xlu1 %45 }
  0x77   :  { %v39_v4 = vmul.f32 %v37_v3, %v17_v0  ;;  %v48_v13 = vsub.f32 %v17_v0, %v46_v12 }
  0x79   :  { %183 = vrcp.f32 %v39_v4  ;;  %v49_v14 = vmul.f32 2.0, %v48_v13 }
  0x7a   :  { %v26_v8 = vpop.permute.xlu0 %25 }
  0x7b   :  { %v28_v10 = vmul.f32 %v26_v8, %v23_v7 }
  0x83   :  { %v184_v9 = vpop.eup %183 }
  0x84   :  { %60 = vrot.lane.b32.xlu0 %v184_v9, %s217_s0  ;;  %51 = vrot.lane.b32.xlu1 %v184_v9, %s218_s20 }
  0x88   :  { %30 = vrot.lane.b32.xlu1 %v28_v10, %s213_s17 }
  0xf6   :  { %v52_v15 = vpop.permute.xlu1 %51  ;;  %v61_v16 = vpop.permute.xlu0 %60 }
  0xf7   :  { %v54_v17 = vmul.f32 %v52_v15, %v49_v14  ;;  %v63_v18 = vmul.f32 %v61_v16, %v49_v14 }
  0xf9   :  { %56 = vrot.lane.b32.xlu0 %v54_v17, %s213_s17  ;;  %65 = vrot.lane.b32.xlu1 %v63_v18, %s213_s17 }
  0xfa   :  { %v31_v19 = vpop.permute.xlu1 %30 }
  0xfb   :  { %185 = vrcp.f32 %v31_v19 }
  0xfd   :  { %116 = vperm.xlu1 %177, %v18_v20  }
 0x105   :  { %v186_v22 = vpop.eup %185 }
 0x106   :  { %v34_v23 = vmul.f32 %v186_v22, %v22_v21 }
 0x108   :  { %101 = vperm.xlu0 %176, %v34_v23  }
 0x10c   :  { %111 = vperm.xlu0 %176, %v18_v20  }
 0x110   :  { %178 = vset.pattern.permute.xlu0 %v220_v24 }
 0x111   :  { %127 = vperm.xlu0 %178, %v18_v20  }
 0x115   :  { %182 = vset.pattern.permute.xlu0 %v221_v25 }
 0x116   :  { %138 = vperm.xlu0 %182, %v18_v20  }
 0x11a   :  { %78 = vrot.lane.b32.xlu0 %v34_v23, %s222_s23 }
 0x16b   :  { %v57_v26 = vpop.permute.xlu0 %56  ;;  %v66_v28 = vpop.permute.xlu1 %65 }
 0x16c   :  { %v59_v27 = vadd.f32 %v57_v26, %v17_v0  ;;  %v68_v29 = vadd.f32 %v66_v28, %v17_v0 }
 0x16e   :  { %91 = vperm.xlu1 %177, %v59_v27  }
 0x172   :  { %179 = vset.pattern.permute.xlu1 %v223_v30 }
 0x173   :  { %96 = vperm.xlu1 %179, %v68_v29  }
 0x177   :  { %180 = vset.pattern.permute.xlu1 %v224_v31 }
 0x178   :  { %132 = vperm.xlu1 %180, %v18_v20  }
 0x17c   :  { %181 = vset.pattern.permute.xlu1 %v223_v30  ;;  %v117_v35 = vpop.permute.xlu1 %116 }
 0x17d   :  { %122 = vperm.xlu1 %181, %v18_v20  }
 0x181   :  { %70 = vrot.lane.b32.xlu1 %v59_v27, %s225_s1 }
 0x185   :  { %74 = vrot.lane.b32.xlu1 %v68_v29, %s225_s1 }
 0x187   :  { %v102_v33 = vpop.permute.xlu0 %101 }
 0x188   :  { %v104_v34 = vadd.f32 %v102_v33, %v89_v32 }
 0x18a   :  { %187 = vrcp.f32 %v104_v34 }
 0x18b   :  { %v112_v38 = vpop.permute.xlu0 %111 }
 0x190   :  { %v128_v45 = vpop.permute.xlu0 %127 }
 0x194   :  { %v188_v41 = vpop.eup %187 }
 0x195   :  { %v139_v53 = vpop.permute.xlu0 %138 }
 0x199   :  { %v79_v60 = vpop.permute.xlu0 %78 }
 0x1ed   :  { %v92_v37 = vpop.permute.xlu1 %91 }
 0x1ee   :  { %v94_v39 = vadd.f32 %v92_v37, %v87_v36 }
 0x1f0   :  { %v107_v44 = vmul.f32 %v188_v41, %v94_v39 }
 0x1f2   :  { %v97_v42 = vpop.permute.xlu1 %96  ;;  %v130_v49 = vmul.f32 %v128_v45, %v107_v44  ;;  %v114_v51 = vmul.f32 %v112_v38, %v107_v44 }
 0x1f3   :  { %v99_v43 = vadd.f32 %v97_v42, %v88_v40 }
 0x1f5   :  { %v108_v46 = vmul.f32 %v188_v41, %v99_v43 }
 0x1f7   :  { %v133_v47 = vpop.permute.xlu1 %132  ;;  %v119_v48 = vmul.f32 %v117_v35, %v108_v46 }
 0x1f8   :  { %v135_v50 = vmul.f32 %v133_v47, %v108_v46 }
 0x1f9   :  { %v120_v54 = vadd.f32 %v119_v48, %v114_v51 }
 0x1fa   :  { %v136_v52 = vadd.f32 %v135_v50, %v130_v49 }
 0x1fc   :  { %v141_v55 = vadd.f32 %v139_v53, %v136_v52  ;;  %v123_v56 = vpop.permute.xlu1 %122 }
 0x1fd   :  { %v125_v57 = vadd.f32 %v123_v56, %v120_v54 }
 0x1fe   :  { %143 = vst [vmem:[%s293_s4 + $0x2] sm:$0x3] %v141_v55 }
 0x1ff   :  { %142 = vst [vmem:[%s293_s4] sm:$0x3] %v125_v57 }
 0x200   :  { %v71_v58 = vpop.permute.xlu1 %70 }
 0x204   :  { %v75_v59 = vpop.permute.xlu1 %74 }
 0x205   :  { %v82_v61 = vsel %vm81_vm0, %v71_v58, %v75_v59 }
 0x206   :  { %v84_v62 = vsel %vm83_vm1, %v82_v61, %v79_v60 }
 0x207   :  { %86 = vst.msk [vmem:[#allocation2] sm:$0x3] %vm85_vm2, %v84_v62 }
 0x208   :  { %200 = shalt.err (!%p197_p4)
}
 0x209   :  { %s201_s11 = scalar_lea.hbm %s292_s3, 32 }
 0x20a   :  { %p202_p5 = scmp.ne.s32.totalorder %s292_s3, %s201_s11  ;;  %p205_p6 = scmp.lt.u32.totalorder %s201_s11, %s292_s3 }
 0x20c   :  { %p207_p7 = pnand %p205_p6, %p202_p5 }
 0x20e   :  { %210 = shalt.err (!%p207_p7)
}
 0x20f   :  { %153 = dma.vmem_to_hbm [thread:$0]  %s151_s8, 32, %s292_s3, [#allocation3]  }
 0x210   :  { %211 = dma.done.wait [#allocation3], 32  }
 0x211   :  { %212 = vsyncadd [#allocation3], 4294967264 }
 0x212   :  { %161 = vsyncpa [#allocation3], 1 }

</bundles_post_ra>
